<compile_context>
chip_gen: v7x
topology: tpu7x:2x2x1
jax: 0.10.0
libtpu: 0.0.40
codegen_flags: <defaults>
</compile_context>

<pallas_src>
import math

import numpy as np
import jax
import jax.numpy as jnp
from jax.experimental import pallas as pl
from jax.experimental.pallas import tpu as pltpu


WINDOW_SIZE = 11
SIGMA = 1.5
LOSS_WEIGHT = 100.0
C1 = 0.01 ** 2
C2 = 0.03 ** 2


def _gaussian_1d(window_size: int, sigma: float) -> np.ndarray:
    """Deterministic re-creation of gaussian(window_size, sigma) from PyTorch."""
    g = np.array(
        [math.exp(-((x - window_size // 2) ** 2) / float(2 * sigma ** 2))
         for x in range(window_size)],
        dtype=np.float64,
    )
    g = g / g.sum()
    return g.astype(np.float32)


def _banded_gaussian_matrix(n: int, window_size: int, sigma: float) -> np.ndarray:
    """Banded matrix A with A[k, j] = g[k - j + pad] inside the band, else 0.

    (X @ A) along the last axis == 1-D Gaussian cross-correlation with zero
    padding (the truncated band at the edges *is* the zero padding).  A is
    symmetric because g is symmetric, so the same matrix handles both
    directions of the separable 2-D conv.
    """
    g = _gaussian_1d(window_size, sigma)
    pad = window_size // 2
    A = np.zeros((n, n), dtype=np.float32)
    for j in range(n):
        for k in range(n):
            d = k - j + pad
            if 0 <= d < window_size:
                A[k, j] = g[d]
    return A


def _vmem_plan():
    """(vmem_limit_bytes, working_set_budget_bytes) tuned per chip generation."""
    try:
        phys = int(pltpu.get_tpu_info().vmem_capacity_bytes)
    except Exception:
        phys = 64 << 20  # conservative: v7x per-TensorCore VMEM
    if phys >= (128 << 20):          # v5e / v6e
        return 100 << 20, 64 << 20
    else:                            # v7x (64 MiB / TC) or unknown
        return 48 << 20, 32 << 20


def _pick_plane_block(nc: int, h: int, w: int, budget_bytes: int) -> int:
    """Largest divisor of nc whose per-step working set fits the VMEM budget.

    Working-set model (f32):
      * 2 inputs x 2 pipeline buffers           -> 4  * b*h*w*4
      * stacked 5-field scratch                  -> 5  * b*h*w*4
      * conv intermediates + SSIM temporaries    -> ~12 * b*h*w*4
      * resident banded constants (x2 buffers)   -> 2 * (h*h + w*w) * 4
    """
    per_plane = (4 + 5 + 12) * h * w * 4
    const_bytes = 2 * (h * h + w * w) * 4
    best = 1
    for b in range(1, nc + 1):
        if nc % b != 0:
            continue
        if const_bytes + b * per_plane <= budget_bytes:
            best = b
    # NOTE: only exact divisors of N*C are considered; a prime NC degrades to
    # b=1 (perf cliff only, not a correctness issue).
    return best


def _make_ssim_kernel(Bblk: int, H: int, W: int):
    F5 = 5 * Bblk
    BW = Bblk * W

    def kernel(a_w_ref, a_h_ref, x_ref, y_ref, out_ref, f_ref):
        x = x_ref[...]          # (Bblk, H, W) f32
        y = y_ref[...]

        # Stack the five fields into VMEM scratch via slice stores (no
        # concatenate copy): order = [x, y, x*x, y*y, x*y].
        f_ref[pl.ds(0 * Bblk, Bblk)] = x
        f_ref[pl.ds(1 * Bblk, Bblk)] = y
        f_ref[pl.ds(2 * Bblk, Bblk)] = x * x
        f_ref[pl.ds(3 * Bblk, Bblk)] = y * y
        f_ref[pl.ds(4 * Bblk, Bblk)] = x * y

        # Separable Gaussian conv as two weight-stationary 2-D MXU matmuls
        # (zero padding folded into the banded matrices).
        # Row pass (along W): (F5*H, W) @ (W, W)
        f = f_ref[...].reshape(F5 * H, W)
        f = jnp.dot(f, a_w_ref[...], preferred_element_type=jnp.float32)
        # Column pass (along H): transpose the stack so H is the lane dim,
        # then (F5*W, H) @ (H, H).  A_H is symmetric, so right-multiply works.
        f = f.reshape(F5, H, W).swapaxes(1, 2).reshape(F5 * W, H)
        f = jnp.dot(f, a_h_ref[...], preferred_element_type=jnp.float32)

        # SSIM elementwise math stays in the (Bblk*W, H) transposed layout;
        # the final reduction is permutation-invariant.
        mu1 = f[0 * BW:1 * BW]
        mu2 = f[1 * BW:2 * BW]
        s11 = f[2 * BW:3 * BW]
        s22 = f[3 * BW:4 * BW]
        s12 = f[4 * BW:5 * BW]

        mu1_sq = mu1 * mu1
        mu2_sq = mu2 * mu2
        mu1_mu2 = mu1 * mu2
        sigma1_sq = s11 - mu1_sq
        sigma2_sq = s22 - mu2_sq
        sigma12 = s12 - mu1_mu2

        num = (2.0 * mu1_mu2 + C1) * (2.0 * sigma12 + C2)
        den = (mu1_sq + mu2_sq + C1) * (sigma1_sq + sigma2_sq + C2)
        # EUP approx reciprocal + one Newton-Raphson step (error << f32 ulp of
        # a plain divide's tolerance, keeps the divide off the VALU).
        r = pl.reciprocal(den, approx=True)
        r = r * (2.0 - den * r)
        ssim_map = num * r                                  # (Bblk*W, H)

        # Partial sum for this grid step (lane dim = H); tiny cross-step /
        # cross-lane reduction happens in the wrapper.
        out_ref[...] = jnp.sum(ssim_map, axis=0).reshape(1, 1, H)

    return kernel


def ssim_loss_pallas(pred, target, loss_weight=LOSS_WEIGHT):
    """loss_weight * (1 - SSIM(pred, target)) with size_average=True (NCHW)."""
    N, C, H, W = pred.shape
    NC = N * C

    x = pred.astype(jnp.float32).reshape(NC, H, W)
    y = target.astype(jnp.float32).reshape(NC, H, W)

    a_h = jnp.asarray(_banded_gaussian_matrix(H, WINDOW_SIZE, SIGMA))
    a_w = jnp.asarray(_banded_gaussian_matrix(W, WINDOW_SIZE, SIGMA))

    vmem_limit, vmem_budget = _vmem_plan()
    Bblk = _pick_plane_block(NC, H, W, vmem_budget)
    G = NC // Bblk

    kernel = _make_ssim_kernel(Bblk, H, W)

    # Advisory cost hint for XLA scheduling around the custom call.
    conv_flops = 2 * 5 * NC * H * W * (W + H)
    elem_flops = 25 * NC * H * W
    cost = pl.CostEstimate(
        flops=int(conv_flops + elem_flops),
        transcendentals=int(NC * H * W),
        bytes_accessed=int(2 * NC * H * W * 4 + (H * H + W * W) * 4 + G * H * 4),
    )

    partials = pl.pallas_call(
        kernel,
        out_shape=jax.ShapeDtypeStruct((G, 1, H), jnp.float32),
        grid=(G,),
        in_specs=[
            # Banded Gaussian operators: resident in VMEM for the whole grid.
            pl.BlockSpec((W, W), lambda i: (0, 0)),
            pl.BlockSpec((H, H), lambda i: (0, 0)),
            # Image planes, Bblk per grid step.
            pl.BlockSpec((Bblk, H, W), lambda i: (i, 0, 0)),
            pl.BlockSpec((Bblk, H, W), lambda i: (i, 0, 0)),
        ],
        out_specs=pl.BlockSpec((1, 1, H), lambda i: (i, 0, 0)),
        scratch_shapes=[pltpu.VMEM((5 * Bblk, H, W), jnp.float32)],
        compiler_params=pltpu.CompilerParams(
            dimension_semantics=("parallel",),
            vmem_limit_bytes=vmem_limit,
        ),
        cost_estimate=cost,
    )(a_w, a_h, x, y)

    mean_ssim = jnp.sum(partials) / jnp.float32(NC * H * W)
    return jnp.float32(loss_weight) * (jnp.float32(1.0) - mean_ssim)


def ssim_loss_ref(pred, target, window_size=WINDOW_SIZE, loss_weight=LOSS_WEIGHT):
    """Pure-JAX reference mirroring the PyTorch _ssim path."""
    N, C, H, W = pred.shape
    pad = window_size // 2
    g = jnp.asarray(_gaussian_1d(window_size, SIGMA))
    win2d = jnp.outer(g, g)
    wk = jnp.broadcast_to(win2d[None, None], (C, 1, window_size, window_size))

    def conv(v):
        return jax.lax.conv_general_dilated(
            v, wk, window_strides=(1, 1), padding=[(pad, pad), (pad, pad)],
            dimension_numbers=("NCHW", "OIHW", "NCHW"), feature_group_count=C)

    img1 = pred.astype(jnp.float32)
    img2 = target.astype(jnp.float32)
    mu1 = conv(img1)
    mu2 = conv(img2)
    mu1_sq, mu2_sq, mu1_mu2 = mu1 * mu1, mu2 * mu2, mu1 * mu2
    sigma1_sq = conv(img1 * img1) - mu1_sq
    sigma2_sq = conv(img2 * img2) - mu2_sq
    sigma12 = conv(img1 * img2) - mu1_mu2
    ssim_map = ((2 * mu1_mu2 + C1) * (2 * sigma12 + C2)) / (
        (mu1_sq + mu2_sq + C1) * (sigma1_sq + sigma2_sq + C2))
    return loss_weight * (1.0 - jnp.mean(ssim_map))


if __name__ == "__main__":
    key = jax.random.PRNGKey(0)
    k1, k2 = jax.random.split(key)
    N, C, H, W = 2, 4, 16, 16
    pred = jax.random.uniform(k1, (N, C, H, W), dtype=jnp.float32)
    target = jax.random.uniform(k2, (N, C, H, W), dtype=jnp.float32)

    loss = jax.block_until_ready(ssim_loss_pallas(pred, target))
    ref = jax.block_until_ready(ssim_loss_ref(pred, target))

    np.testing.assert_allclose(np.asarray(loss), np.asarray(ref),
                               rtol=2e-3, atol=5e-2)
    print("KERNEL_OK")
</pallas_src>

<mosaic_0001>
module attributes {stable_mosaic.version = 11 : i64} {
  func.func @kernel(%arg0: i32, %arg1: memref<16x16xf32, #tpu.memory_space<vmem>>, %arg2: memref<16x16xf32, #tpu.memory_space<vmem>>, %arg3: memref<8x16x16xf32, #tpu.memory_space<vmem>>, %arg4: memref<8x16x16xf32, #tpu.memory_space<vmem>>, %arg5: memref<1x1x16xf32, #tpu.memory_space<vmem>>, %arg6: memref<40x16x16xf32, #tpu.memory_space<vmem>>) attributes {dimension_semantics = [#tpu.dimension_semantics<parallel>], iteration_bounds = array<i64: 1>, scalar_prefetch = 0 : i64, scratch_operands = 1 : i64, tpu.core_type = #tpu.core_type<tc>, window_params = [{pipeline_mode = #tpu.pipeline_mode<synchronous>, transform_indices = @transform_0, window_bounds = array<i64: 16, 16>}, {pipeline_mode = #tpu.pipeline_mode<synchronous>, transform_indices = @transform_1, window_bounds = array<i64: 16, 16>}, {transform_indices = @transform_2, window_bounds = array<i64: 8, 16, 16>}, {transform_indices = @transform_3, window_bounds = array<i64: 8, 16, 16>}, {transform_indices = @transform_4, window_bounds = array<i64: 1, 1, 16>}]} {
    %c0 = arith.constant 0 : index
    %c0_0 = arith.constant 0 : index
    %c0_1 = arith.constant 0 : index
    %0 = vector.load %arg3[%c0, %c0_0, %c0_1] : memref<8x16x16xf32, #tpu.memory_space<vmem>>, vector<8x16x16xf32>
    %c0_2 = arith.constant 0 : index
    %c0_3 = arith.constant 0 : index
    %c0_4 = arith.constant 0 : index
    %1 = vector.load %arg4[%c0_2, %c0_3, %c0_4] : memref<8x16x16xf32, #tpu.memory_space<vmem>>, vector<8x16x16xf32>
    %c0_5 = arith.constant 0 : index
    %c0_6 = arith.constant 0 : index
    %c0_7 = arith.constant 0 : index
    %2 = vector.load %arg6[%c0_5, %c0_6, %c0_7] : memref<40x16x16xf32, #tpu.memory_space<vmem>>, vector<8x16x16xf32>
    tpu.vector_store %arg6[%c0_5, %c0_6, %c0_7], %0 {strides = array<i32>} : memref<40x16x16xf32, #tpu.memory_space<vmem>>, vector<8x16x16xf32>,
    %c8 = arith.constant 8 : index
    %c0_8 = arith.constant 0 : index
    %c0_9 = arith.constant 0 : index
    %3 = vector.load %arg6[%c8, %c0_8, %c0_9] : memref<40x16x16xf32, #tpu.memory_space<vmem>>, vector<8x16x16xf32>
    tpu.vector_store %arg6[%c8, %c0_8, %c0_9], %1 {strides = array<i32>} : memref<40x16x16xf32, #tpu.memory_space<vmem>>, vector<8x16x16xf32>,
    %4 = arith.mulf %0, %0 : vector<8x16x16xf32>
    %c16 = arith.constant 16 : index
    %c0_10 = arith.constant 0 : index
    %c0_11 = arith.constant 0 : index
    %5 = vector.load %arg6[%c16, %c0_10, %c0_11] : memref<40x16x16xf32, #tpu.memory_space<vmem>>, vector<8x16x16xf32>
    tpu.vector_store %arg6[%c16, %c0_10, %c0_11], %4 {strides = array<i32>} : memref<40x16x16xf32, #tpu.memory_space<vmem>>, vector<8x16x16xf32>,
    %6 = arith.mulf %1, %1 : vector<8x16x16xf32>
    %c24 = arith.constant 24 : index
    %c0_12 = arith.constant 0 : index
    %c0_13 = arith.constant 0 : index
    %7 = vector.load %arg6[%c24, %c0_12, %c0_13] : memref<40x16x16xf32, #tpu.memory_space<vmem>>, vector<8x16x16xf32>
    tpu.vector_store %arg6[%c24, %c0_12, %c0_13], %6 {strides = array<i32>} : memref<40x16x16xf32, #tpu.memory_space<vmem>>, vector<8x16x16xf32>,
    %8 = arith.mulf %0, %1 : vector<8x16x16xf32>
    %c32 = arith.constant 32 : index
    %c0_14 = arith.constant 0 : index
    %c0_15 = arith.constant 0 : index
    %9 = vector.load %arg6[%c32, %c0_14, %c0_15] : memref<40x16x16xf32, #tpu.memory_space<vmem>>, vector<8x16x16xf32>
    tpu.vector_store %arg6[%c32, %c0_14, %c0_15], %8 {strides = array<i32>} : memref<40x16x16xf32, #tpu.memory_space<vmem>>, vector<8x16x16xf32>,
    %c0_16 = arith.constant 0 : index
    %c0_17 = arith.constant 0 : index
    %c0_18 = arith.constant 0 : index
    %10 = vector.load %arg6[%c0_16, %c0_17, %c0_18] : memref<40x16x16xf32, #tpu.memory_space<vmem>>, vector<40x16x16xf32>
    %11 = vector.shape_cast %10 : vector<40x16x16xf32> to vector<640x16xf32>
    %c0_19 = arith.constant 0 : index
    %c0_20 = arith.constant 0 : index
    %12 = vector.load %arg1[%c0_19, %c0_20] : memref<16x16xf32, #tpu.memory_space<vmem>>, vector<16x16xf32>
    %cst = arith.constant dense<0.000000e+00> : vector<640x16xf32>
    %13 = tpu.matmul %11, %12, %cst {dimension_numbers = #tpu.dot_dimension_numbers<[1], [0], [0], [1], [0, 0, 1, 1], [], []>} : vector<640x16xf32>, vector<16x16xf32>, vector<640x16xf32> -> vector<640x16xf32>
    %14 = vector.shape_cast %13 : vector<640x16xf32> to vector<40x16x16xf32>
    %15 = tpu.transpose %14, [0, 2, 1] : vector<40x16x16xf32> -> vector<40x16x16xf32>
    %16 = vector.shape_cast %15 : vector<40x16x16xf32> to vector<640x16xf32>
    %c0_21 = arith.constant 0 : index
    %c0_22 = arith.constant 0 : index
    %17 = vector.load %arg2[%c0_21, %c0_22] : memref<16x16xf32, #tpu.memory_space<vmem>>, vector<16x16xf32>
    %cst_23 = arith.constant dense<0.000000e+00> : vector<640x16xf32>
    %18 = tpu.matmul %16, %17, %cst_23 {dimension_numbers = #tpu.dot_dimension_numbers<[1], [0], [0], [1], [0, 0, 1, 1], [], []>} : vector<640x16xf32>, vector<16x16xf32>, vector<640x16xf32> -> vector<640x16xf32>
    %19 = vector.extract_strided_slice %18 {offsets = [0, 0], sizes = [128, 16], strides = [1, 1]} : vector<640x16xf32> to vector<128x16xf32>
    %20 = vector.extract_strided_slice %18 {offsets = [128, 0], sizes = [128, 16], strides = [1, 1]} : vector<640x16xf32> to vector<128x16xf32>
    %21 = vector.extract_strided_slice %18 {offsets = [256, 0], sizes = [128, 16], strides = [1, 1]} : vector<640x16xf32> to vector<128x16xf32>
    %22 = vector.extract_strided_slice %18 {offsets = [384, 0], sizes = [128, 16], strides = [1, 1]} : vector<640x16xf32> to vector<128x16xf32>
    %23 = vector.extract_strided_slice %18 {offsets = [512, 0], sizes = [128, 16], strides = [1, 1]} : vector<640x16xf32> to vector<128x16xf32>
    %24 = arith.mulf %19, %19 : vector<128x16xf32>
    %25 = arith.mulf %20, %20 : vector<128x16xf32>
    %26 = arith.mulf %19, %20 : vector<128x16xf32>
    %27 = arith.subf %21, %24 : vector<128x16xf32>
    %28 = arith.subf %22, %25 : vector<128x16xf32>
    %29 = arith.subf %23, %26 : vector<128x16xf32>
    %cst_24 = arith.constant 2.000000e+00 : f32
    %30 = vector.broadcast %cst_24 : f32 to vector<128x16xf32>
    %31 = arith.mulf %30, %26 : vector<128x16xf32>
    %cst_25 = arith.constant 9.99999974E-5 : f32
    %32 = vector.broadcast %cst_25 : f32 to vector<128x16xf32>
    %33 = arith.addf %31, %32 : vector<128x16xf32>
    %cst_26 = arith.constant 2.000000e+00 : f32
    %34 = vector.broadcast %cst_26 : f32 to vector<128x16xf32>
    %35 = arith.mulf %34, %29 : vector<128x16xf32>
    %cst_27 = arith.constant 8.99999984E-4 : f32
    %36 = vector.broadcast %cst_27 : f32 to vector<128x16xf32>
    %37 = arith.addf %35, %36 : vector<128x16xf32>
    %38 = arith.mulf %33, %37 : vector<128x16xf32>
    %39 = arith.addf %24, %25 : vector<128x16xf32>
    %cst_28 = arith.constant 9.99999974E-5 : f32
    %40 = vector.broadcast %cst_28 : f32 to vector<128x16xf32>
    %41 = arith.addf %39, %40 : vector<128x16xf32>
    %42 = arith.addf %27, %28 : vector<128x16xf32>
    %cst_29 = arith.constant 8.99999984E-4 : f32
    %43 = vector.broadcast %cst_29 : f32 to vector<128x16xf32>
    %44 = arith.addf %42, %43 : vector<128x16xf32>
    %45 = arith.mulf %41, %44 : vector<128x16xf32>
    %46 = tpu.reciprocal %45 {approx = true} : vector<128x16xf32> -> vector<128x16xf32>
    %47 = arith.mulf %45, %46 : vector<128x16xf32>
    %cst_30 = arith.constant 2.000000e+00 : f32
    %48 = vector.broadcast %cst_30 : f32 to vector<128x16xf32>
    %49 = arith.subf %48, %47 : vector<128x16xf32>
    %50 = arith.mulf %46, %49 : vector<128x16xf32>
    %51 = arith.mulf %38, %50 : vector<128x16xf32>
    %cst_31 = arith.constant dense<0.000000e+00> : vector<16xf32>
    %52 = vector.multi_reduction <add>, %51, %cst_31 [0] : vector<128x16xf32> to vector<16xf32>
    %53 = vector.shape_cast %52 : vector<16xf32> to vector<1x1x16xf32>
    %c0_32 = arith.constant 0 : index
    %c0_33 = arith.constant 0 : index
    %c0_34 = arith.constant 0 : index
    %54 = vector.load %arg5[%c0_32, %c0_33, %c0_34] : memref<1x1x16xf32, #tpu.memory_space<vmem>>, vector<1x1x16xf32>
    tpu.vector_store %arg5[%c0_32, %c0_33, %c0_34], %53 {strides = array<i32>} : memref<1x1x16xf32, #tpu.memory_space<vmem>>, vector<1x1x16xf32>,
    return
  }
  func.func @transform_0(%arg0: i32) -> (i32, i32) {
    %c0_i32 = arith.constant 0 : i32
    %c0_i32_0 = arith.constant 0 : i32
    %c0_i32_1 = arith.constant 0 : i32
    return %c0_i32, %c0_i32_0 : i32, i32
  }
  func.func @transform_1(%arg0: i32) -> (i32, i32) {
    %c0_i32 = arith.constant 0 : i32
    %c0_i32_0 = arith.constant 0 : i32
    %c0_i32_1 = arith.constant 0 : i32
    return %c0_i32, %c0_i32_0 : i32, i32
  }
  func.func @transform_2(%arg0: i32) -> (i32, i32, i32) {
    %c0_i32 = arith.constant 0 : i32
    %c0_i32_0 = arith.constant 0 : i32
    %c0_i32_1 = arith.constant 0 : i32
    return %arg0, %c0_i32, %c0_i32_0 : i32, i32, i32
  }
  func.func @transform_3(%arg0: i32) -> (i32, i32, i32) {
    %c0_i32 = arith.constant 0 : i32
    %c0_i32_0 = arith.constant 0 : i32
    %c0_i32_1 = arith.constant 0 : i32
    return %arg0, %c0_i32, %c0_i32_0 : i32, i32, i32
  }
  func.func @transform_4(%arg0: i32) -> (i32, i32, i32) {
    %c0_i32 = arith.constant 0 : i32
    %c0_i32_0 = arith.constant 0 : i32
    %c0_i32_1 = arith.constant 0 : i32
    return %arg0, %c0_i32, %c0_i32_0 : i32, i32, i32
  }
}

</mosaic_0001>

<bundles_post_ra>
// kernel: tpu_custom_call.1
= control target key start
LH: loop header
LB: loop body
LE: loop exit
PB: predicated region body
PF: predicated region fallthrough
CT: control target
= control target key end

     0   :  { %9 = vsyncpa [#allocation4], 0  ;;  %s5115_s0 = inlined_call_operand.hbm [shape: f32[16,16], index: 0, kind: input, shape index: {}]   ;;  %s5116_s1 = inlined_call_operand.hbm [shape: f32[16,16], index: 1, kind: input, shape index: {}]   ;;  %s5117_s2 = inlined_call_operand.hbm [shape: f32[8,16,16], index: 2, kind: input, shape index: {}]   ;;  %s5118_s3 = inlined_call_operand.hbm [shape: f32[8,16,16], index: 3, kind: input, shape index: {}]   ;;  %s5119_s4 = inlined_call_operand.hbm [shape: f32[1,1,16], index: 4, kind: output, shape index: {}]  }
   0x1   :  { %10 = vsyncpa [#allocation7], 0 }
   0x2   :  { %11 = vsyncpa [#allocation10], 0 }
   0x3   :  { %12 = vsyncpa [#allocation5], 0  ;;  %s4142_s15 = smov [#allocation6]   ;;  %s4143_s17 = smov [#allocation3]  }
   0x4   :  { %s30_s16 = sshll.u32 %s4142_s15, 4  ;;  %s18_s18 = sshll.u32 %s4143_s17, 4  ;;  %s31_s16 = int_to_ptr.vmem [resolvable:$true] %s30_s16  ;;  %s4174_s18 = int_to_ptr.vmem [resolvable:$true] %s18_s18 }
   0x5   :  { %s4024_s21 = scalar_lea.hbm %s5116_s1, 256 }
   0x6   :  { %p4025_p0 = scmp.ne.s32.totalorder %s5116_s1, %s4024_s21  ;;  %p4028_p1 = scmp.lt.u32.totalorder %s4024_s21, %s5116_s1 }
   0x8   :  { %p4030_p2 = pnand %p4028_p1, %p4025_p0 }
   0xa   :  { %4033 = shalt.err (!%p4030_p2)
}
   0xb   :  { %s4034_s26 = scalar_lea.vmem %s31_s16, 256  ;;  %p4039_p4 = scmp.lt.s32.totalorder %s31_s16, %s31_s16 }
   0xc   :  { %p4035_p3 = scmp.ne.s32.totalorder %s31_s16, %s4034_s26  ;;  %p4040_p5 = scmp.lt.s32.totalorder %s4034_s26, %s4034_s26 }
   0xe   :  { %p4041_p6 = por %p4040_p5, %p4039_p4 }
  0x10   :  { %p4042_p7 = pnand %p4041_p6, %p4035_p3 }
  0x12   :  { %4045 = shalt.err (!%p4042_p7)
}
  0x13   :  { %s4144_s27 = smov 128   ;;  %s4145_s28 = smov 8  }
  0x14   :  { %36 = dma.hbm_to_vmem [thread:$0]  %s5116_s1, 256, %s31_s16, [#allocation7], %s4144_s27, %s4144_s27, %s4145_s28  }
  0x15   :  { %s4046_s7 = scalar_lea.hbm %s5115_s0, 256 }
  0x16   :  { %p4047_p8 = scmp.ne.s32.totalorder %s5115_s0, %s4046_s7  ;;  %p4050_p9 = scmp.lt.u32.totalorder %s4046_s7, %s5115_s0 }
  0x18   :  { %p4052_p10 = pnand %p4050_p9, %p4047_p8 }
  0x1a   :  { %4055 = shalt.err (!%p4052_p10)
}
  0x1b   :  { %s4056_s12 = scalar_lea.vmem %s4174_s18, 256  ;;  %p4061_p12 = scmp.lt.s32.totalorder %s4174_s18, %s4174_s18 }
  0x1c   :  { %p4057_p11 = scmp.ne.s32.totalorder %s4174_s18, %s4056_s12  ;;  %p4062_p13 = scmp.lt.s32.totalorder %s4056_s12, %s4056_s12 }
  0x1e   :  { %p4063_p0 = por %p4062_p13, %p4061_p12 }
  0x20   :  { %p4064_p1 = pnand %p4063_p0, %p4057_p11 }
  0x22   :  { %4067 = shalt.err (!%p4064_p1)
}
  0x23   :  { %24 = dma.hbm_to_vmem [thread:$0]  %s5115_s0, 256, %s4174_s18, [#allocation4], %s4144_s27, %s4144_s27, %s4145_s28  }
  0x24   :  { %s4146_s14 = smov [#allocation8]   ;;  %s4147_s16 = smov [#allocation9]  }
  0x25   :  { %s42_s15 = sshll.u32 %s4146_s14, 4  ;;  %s54_s17 = sshll.u32 %s4147_s16, 4  ;;  %s43_s15 = int_to_ptr.vmem [resolvable:$true] %s42_s15  ;;  %s4211_s17 = int_to_ptr.vmem [resolvable:$true] %s54_s17 }
  0x26   :  { %s4068_s21 = scalar_lea.hbm %s5117_s2, 2048 }
  0x27   :  { %p4069_p2 = scmp.ne.s32.totalorder %s5117_s2, %s4068_s21  ;;  %p4072_p3 = scmp.lt.u32.totalorder %s4068_s21, %s5117_s2 }
  0x29   :  { %p4074_p4 = pnand %p4072_p3, %p4069_p2 }
  0x2b   :  { %4077 = shalt.err (!%p4074_p4)
}
  0x2c   :  { %s4078_s0 = scalar_lea.vmem %s43_s15, 2048  ;;  %p4083_p6 = scmp.lt.s32.totalorder %s43_s15, %s43_s15 }
  0x2d   :  { %p4079_p5 = scmp.ne.s32.totalorder %s43_s15, %s4078_s0  ;;  %p4084_p7 = scmp.lt.s32.totalorder %s4078_s0, %s4078_s0 }
  0x2f   :  { %p4085_p8 = por %p4084_p7, %p4083_p6 }
  0x31   :  { %p4086_p9 = pnand %p4085_p8, %p4079_p5 }
  0x33   :  { %4089 = shalt.err (!%p4086_p9)
}
  0x34   :  { %48 = dma.hbm_to_vmem [thread:$0]  %s5117_s2, 2048, %s43_s15, [#allocation7], %s4144_s27, %s4144_s27, %s4145_s28  }
  0x35   :  { %s4090_s5 = scalar_lea.hbm %s5118_s3, 2048 }
  0x36   :  { %p4091_p10 = scmp.ne.s32.totalorder %s5118_s3, %s4090_s5  ;;  %p4094_p11 = scmp.lt.u32.totalorder %s4090_s5, %s5118_s3 }
  0x38   :  { %p4096_p12 = pnand %p4094_p11, %p4091_p10 }
  0x3a   :  { %4099 = shalt.err (!%p4096_p12)
}
  0x3b   :  { %s4100_s10 = scalar_lea.vmem %s4211_s17, 2048  ;;  %p4105_p0 = scmp.lt.s32.totalorder %s4211_s17, %s4211_s17 }
  0x3c   :  { %p4101_p13 = scmp.ne.s32.totalorder %s4211_s17, %s4100_s10  ;;  %p4106_p1 = scmp.lt.s32.totalorder %s4100_s10, %s4100_s10 }
  0x3e   :  { %p4107_p2 = por %p4106_p1, %p4105_p0 }
  0x40   :  { %p4108_p3 = pnand %p4107_p2, %p4101_p13 }
  0x42   :  { %4111 = shalt.err (!%p4108_p3)
}
  0x43   :  { %60 = dma.hbm_to_vmem [thread:$0]  %s5118_s3, 2048, %s4211_s17, [#allocation10], %s4144_s27, %s4144_s27, %s4145_s28  }
  0x44   :  { %4134 = dma.done.wait [#allocation4], 256  }
  0x45   :  { %4135 = vsyncadd [#allocation4], 4294967040 }
  0x46   :  { %4136 = dma.done.wait [#allocation7], 2304  }
  0x47   :  { %4137 = vsyncadd [#allocation7], 4294964992 }
  0x48   :  { %4138 = dma.done.wait [#allocation10], 2048  }
  0x49   :  { %4139 = vsyncadd [#allocation10], 4294965248  ;;  %vm105_vm0 = vcmask 130048   ;;  %v318_v0 = vld [vmem:[#allocation3] sm:$0xff]  ;;  %v319_v1 = vld [vmem:[#allocation3 + $0x8] sm:$0xff]  ;;  %s4148_s3 = smov [#allocation11]  }
  0x4a   :  { %v73_v2 = vld [vmem:[#allocation8] sm:$0xff]  ;;  %v3976_v3 = vpack.c.bf16 %v319_v1, %v318_v0  ;;  %v4249_v6 = vld [vmem:[#allocation8 + $0x8] sm:$0xff]  ;;  %v4251_v7 = vld [vmem:[#allocation8 + $0x10] sm:$0xff]  ;;  %s3393_s27 = sshll.u32 %s4148_s3, 4  ;;  %vm3385_vm1 = vcmask 122880   ;;  %s3394_s27 = int_to_ptr.vmem [resolvable:$true] %s3393_s27 }
  0x4b   :  { %v89_v4 = vld [vmem:[#allocation9] sm:$0xff]  ;;  %106 = vst.msk [vmem:[#allocation2] sm:$0xff] %vm105_vm0, %v73_v2  ;;  %v139_v5 = vmul.f32 %v73_v2, %v73_v2  ;;  %107 = vst.msk [vmem:[#allocation2 + $0x8] sm:$0xff] %vm105_vm0, %v4249_v6  ;;  %v4258_v9 = vld [vmem:[#allocation8 + $0x18] sm:$0xff]  ;;  %v140_v12 = vmul.f32 %v4249_v6, %v4249_v6  ;;  %v141_v13 = vmul.f32 %v4251_v7, %v4251_v7  ;;  %s4112_s28 = scalar_lea.vmem %s3394_s27, 16  ;;  %s4116_s12 = scalar_lea.vmem %s3394_s27, 32 }
  0x4c   :  { %v205_v8 = vmul.f32 %v89_v4, %v73_v2  ;;  %123 = vst.msk [vmem:[#allocation2 + $0x80] sm:$0xff] %vm105_vm0, %v89_v4  ;;  %108 = vst.msk [vmem:[#allocation2 + $0x10] sm:$0xff] %vm105_vm0, %v4251_v7  ;;  %v4260_v10 = vld [vmem:[#allocation8 + $0x20] sm:$0xff]  ;;  %v4262_v11 = vld [vmem:[#allocation8 + $0x28] sm:$0xff]  ;;  %v172_v14 = vmul.f32 %v89_v4, %v89_v4  ;;  %3977 = vmatprep.subr.bf16.mxu0 %v3976_v3  ;;  %v142_v18 = vmul.f32 %v4258_v9, %v4258_v9  ;;  %p4113_p4 = scmp.ne.s32.totalorder %s3394_s27, %s4112_s28  ;;  %p4117_p5 = scmp.lt.s32.totalorder %s3394_s27, %s3394_s27 }
  0x4d   :  { %156 = vst.msk [vmem:[#allocation2 + $0x100] sm:$0xff] %vm105_vm0, %v139_v5  ;;  %109 = vst.msk [vmem:[#allocation2 + $0x18] sm:$0xff] %vm105_vm0, %v4258_v9  ;;  %v4275_v15 = vld [vmem:[#allocation8 + $0x30] sm:$0xff]  ;;  %v4277_v16 = vld [vmem:[#allocation8 + $0x38] sm:$0xff]  ;;  %v143_v19 = vmul.f32 %v4260_v10, %v4260_v10  ;;  %v144_v20 = vmul.f32 %v4262_v11, %v4262_v11  ;;  %3979 = vmatpush3.bf16.msra.mxu0 %v3976_v3  ;;  %p4118_p6 = scmp.lt.s32.totalorder %s4116_s12, %s4112_s28 }
  0x4e   :  { %110 = vst.msk [vmem:[#allocation2 + $0x20] sm:$0xff] %vm105_vm0, %v4260_v10  ;;  %111 = vst.msk [vmem:[#allocation2 + $0x28] sm:$0xff] %vm105_vm0, %v4262_v11  ;;  %v4279_v17 = vld [vmem:[#allocation8 + $0x40] sm:$0xff]  ;;  %v4294_v21 = vld [vmem:[#allocation8 + $0x48] sm:$0xff]  ;;  %v145_v24 = vmul.f32 %v4275_v15, %v4275_v15  ;;  %v146_v25 = vmul.f32 %v4277_v16, %v4277_v16 }
  0x4f   :  { %222 = vst.msk [vmem:[#allocation2 + $0x200] sm:$0xff] %vm105_vm0, %v205_v8  ;;  %112 = vst.msk [vmem:[#allocation2 + $0x30] sm:$0xff] %vm105_vm0, %v4275_v15  ;;  %v4296_v22 = vld [vmem:[#allocation8 + $0x50] sm:$0xff]  ;;  %v4298_v23 = vld [vmem:[#allocation8 + $0x58] sm:$0xff]  ;;  %v147_v26 = vmul.f32 %v4279_v17, %v4279_v17  ;;  %v148_v30 = vmul.f32 %v4294_v21, %v4294_v21  ;;  %p4119_p7 = por %p4118_p6, %p4117_p5 }
  0x50   :  { %113 = vst.msk [vmem:[#allocation2 + $0x38] sm:$0xff] %vm105_vm0, %v4277_v16  ;;  %114 = vst.msk [vmem:[#allocation2 + $0x40] sm:$0xff] %vm105_vm0, %v4279_v17  ;;  %v4315_v27 = vld [vmem:[#allocation8 + $0x60] sm:$0xff]  ;;  %v4317_v28 = vld [vmem:[#allocation8 + $0x68] sm:$0xff]  ;;  %v149_v31 = vmul.f32 %v4296_v22, %v4296_v22  ;;  %v150_v32 = vmul.f32 %v4298_v23, %v4298_v23 }
  0x51   :  { %157 = vst.msk [vmem:[#allocation2 + $0x108] sm:$0xff] %vm105_vm0, %v140_v12  ;;  %158 = vst.msk [vmem:[#allocation2 + $0x110] sm:$0xff] %vm105_vm0, %v141_v13  ;;  %v4319_v29 = vld [vmem:[#allocation8 + $0x70] sm:$0xff]  ;;  %v4336_v33 = vld [vmem:[#allocation8 + $0x78] sm:$0xff]  ;;  %v151_v36 = vmul.f32 %v4315_v27, %v4315_v27  ;;  %v152_v37 = vmul.f32 %v4317_v28, %v4317_v28  ;;  %p4120_p8 = pnand %p4119_p7, %p4113_p4 }
  0x52   :  { %189 = vst.msk [vmem:[#allocation2 + $0x180] sm:$0xff] %vm105_vm0, %v172_v14  ;;  %115 = vst.msk [vmem:[#allocation2 + $0x48] sm:$0xff] %vm105_vm0, %v4294_v21  ;;  %v90_v34 = vld [vmem:[#allocation9 + $0x8] sm:$0xff]  ;;  %v91_v35 = vld [vmem:[#allocation9 + $0x10] sm:$0xff]  ;;  %v153_v38 = vmul.f32 %v4319_v29, %v4319_v29  ;;  %v154_v42 = vmul.f32 %v4336_v33, %v4336_v33 }
  0x53   :  { %116 = vst.msk [vmem:[#allocation2 + $0x50] sm:$0xff] %vm105_vm0, %v4296_v22  ;;  %117 = vst.msk [vmem:[#allocation2 + $0x58] sm:$0xff] %vm105_vm0, %v4298_v23  ;;  %v92_v39 = vld [vmem:[#allocation9 + $0x18] sm:$0xff]  ;;  %v93_v40 = vld [vmem:[#allocation9 + $0x20] sm:$0xff]  ;;  %v173_v43 = vmul.f32 %v90_v34, %v90_v34  ;;  %v174_v44 = vmul.f32 %v91_v35, %v91_v35  ;;  %v206_v45 = vmul.f32 %v90_v34, %v4249_v6 }
  0x54   :  { %159 = vst.msk [vmem:[#allocation2 + $0x118] sm:$0xff] %vm105_vm0, %v142_v18  ;;  %160 = vst.msk [vmem:[#allocation2 + $0x120] sm:$0xff] %vm105_vm0, %v143_v19  ;;  %v94_v41 = vld [vmem:[#allocation9 + $0x28] sm:$0xff]  ;;  %v238_v46 = vld [vmem:[#allocation2] sm:$0xff]  ;;  %v175_v49 = vmul.f32 %v92_v39, %v92_v39  ;;  %v176_v50 = vmul.f32 %v93_v40, %v93_v40  ;;  %v207_v52 = vmul.f32 %v91_v35, %v4251_v7 }
  0x55   :  { %161 = vst.msk [vmem:[#allocation2 + $0x128] sm:$0xff] %vm105_vm0, %v144_v20  ;;  %118 = vst.msk [vmem:[#allocation2 + $0x60] sm:$0xff] %vm105_vm0, %v4315_v27  ;;  %v95_v47 = vld [vmem:[#allocation9 + $0x30] sm:$0xff]  ;;  %v96_v48 = vld [vmem:[#allocation9 + $0x38] sm:$0xff]  ;;  %v177_v51 = vmul.f32 %v94_v41, %v94_v41  ;;  %3732 = vmatprep.mubr.msk.f32.mxu0 %vm105_vm0, %v238_v46  ;;  %v208_v57 = vmul.f32 %v92_v39, %v4258_v9  ;;  %v209_v58 = vmul.f32 %v93_v40, %v4260_v10 }
  0x56   :  { %119 = vst.msk [vmem:[#allocation2 + $0x68] sm:$0xff] %vm105_vm0, %v4317_v28  ;;  %120 = vst.msk [vmem:[#allocation2 + $0x70] sm:$0xff] %vm105_vm0, %v4319_v29  ;;  %v239_v53 = vld [vmem:[#allocation2 + $0x8] sm:$0xff]  ;;  %v240_v54 = vld [vmem:[#allocation2 + $0x10] sm:$0xff]  ;;  %v178_v55 = vmul.f32 %v95_v47, %v95_v47  ;;  %v179_v56 = vmul.f32 %v96_v48, %v96_v48  ;;  %v210_v59 = vmul.f32 %v94_v41, %v4262_v11 }
  0x57   :  { %162 = vst.msk [vmem:[#allocation2 + $0x130] sm:$0xff] %vm105_vm0, %v145_v24  ;;  %163 = vst.msk [vmem:[#allocation2 + $0x138] sm:$0xff] %vm105_vm0, %v146_v25  ;;  %3733 = vmatmul.mubr.msk.f32.vlgmr.msra.gmra.mrb[0].mxu0 %vm105_vm0, %v239_v53  ;;  %v241_v60 = vld [vmem:[#allocation2 + $0x18] sm:$0xff]  ;;  %v211_v61 = vmul.f32 %v95_v47, %v4275_v15  ;;  %v242_v62 = vld [vmem:[#allocation2 + $0x20] sm:$0xff]  ;;  %v212_v63 = vmul.f32 %v96_v48, %v4277_v16 }
  0x58   :  { %164 = vst.msk [vmem:[#allocation2 + $0x140] sm:$0xff] %vm105_vm0, %v147_v26  ;;  %121 = vst.msk [vmem:[#allocation2 + $0x78] sm:$0xff] %vm105_vm0, %v4336_v33  ;;  %3735 = vmatprep.mubr.msk.f32.mxu0 %vm105_vm0, %v240_v54  ;;  %v243_v0 = vld [vmem:[#allocation2 + $0x28] sm:$0xff]  ;;  %v244_v1 = vld [vmem:[#allocation2 + $0x30] sm:$0xff] }
  0x59   :  { %124 = vst.msk [vmem:[#allocation2 + $0x88] sm:$0xff] %vm105_vm0, %v90_v34  ;;  %125 = vst.msk [vmem:[#allocation2 + $0x90] sm:$0xff] %vm105_vm0, %v91_v35  ;;  %v97_v2 = vld [vmem:[#allocation9 + $0x40] sm:$0xff]  ;;  %v98_v3 = vld [vmem:[#allocation9 + $0x48] sm:$0xff] }
  0x5a   :  { %165 = vst.msk [vmem:[#allocation2 + $0x148] sm:$0xff] %vm105_vm0, %v148_v30  ;;  %166 = vst.msk [vmem:[#allocation2 + $0x150] sm:$0xff] %vm105_vm0, %v149_v31  ;;  %v99_v4 = vld [vmem:[#allocation9 + $0x50] sm:$0xff]  ;;  %v100_v5 = vld [vmem:[#allocation9 + $0x58] sm:$0xff]  ;;  %v180_v6 = vmul.f32 %v97_v2, %v97_v2  ;;  %v213_v7 = vmul.f32 %v97_v2, %v4279_v17  ;;  %v181_v11 = vmul.f32 %v98_v3, %v98_v3 }
  0x5b   :  { %167 = vst.msk [vmem:[#allocation2 + $0x158] sm:$0xff] %vm105_vm0, %v150_v32  ;;  %126 = vst.msk [vmem:[#allocation2 + $0x98] sm:$0xff] %vm105_vm0, %v92_v39  ;;  %3736 = vmatmul.mubr.msk.f32.gmra.mrb[2].mxu0 %vm105_vm0, %v241_v60  ;;  %v101_v8 = vld [vmem:[#allocation9 + $0x60] sm:$0xff]  ;;  %v102_v9 = vld [vmem:[#allocation9 + $0x68] sm:$0xff]  ;;  %v182_v12 = vmul.f32 %v99_v4, %v99_v4  ;;  %v183_v13 = vmul.f32 %v100_v5, %v100_v5  ;;  %v214_v14 = vmul.f32 %v98_v3, %v4294_v21 }
  0x5c   :  { %127 = vst.msk [vmem:[#allocation2 + $0xa0] sm:$0xff] %vm105_vm0, %v93_v40  ;;  %128 = vst.msk [vmem:[#allocation2 + $0xa8] sm:$0xff] %vm105_vm0, %v94_v41  ;;  %3738 = vmatprep.mubr.msk.f32.mxu0 %vm105_vm0, %v242_v62  ;;  %v103_v10 = vld [vmem:[#allocation9 + $0x70] sm:$0xff]  ;;  %v245_v15 = vld [vmem:[#allocation2 + $0x38] sm:$0xff]  ;;  %v184_v17 = vmul.f32 %v101_v8, %v101_v8  ;;  %v185_v18 = vmul.f32 %v102_v9, %v102_v9  ;;  %v215_v20 = vmul.f32 %v99_v4, %v4296_v22 }
  0x5d   :  { %168 = vst.msk [vmem:[#allocation2 + $0x160] sm:$0xff] %vm105_vm0, %v151_v36  ;;  %169 = vst.msk [vmem:[#allocation2 + $0x168] sm:$0xff] %vm105_vm0, %v152_v37  ;;  %v104_v16 = vld [vmem:[#allocation9 + $0x78] sm:$0xff]  ;;  %v186_v19 = vmul.f32 %v103_v10, %v103_v10  ;;  %v246_v21 = vld [vmem:[#allocation2 + $0x40] sm:$0xff]  ;;  %v216_v25 = vmul.f32 %v100_v5, %v4298_v23  ;;  %v217_v26 = vmul.f32 %v101_v8, %v4315_v27 }
  0x5e   :  { %170 = vst.msk [vmem:[#allocation2 + $0x170] sm:$0xff] %vm105_vm0, %v153_v38  ;;  %129 = vst.msk [vmem:[#allocation2 + $0xb0] sm:$0xff] %vm105_vm0, %v95_v47  ;;  %v187_v24 = vmul.f32 %v104_v16, %v104_v16  ;;  %v247_v22 = vld [vmem:[#allocation2 + $0x48] sm:$0xff]  ;;  %v248_v23 = vld [vmem:[#allocation2 + $0x50] sm:$0xff]  ;;  %v218_v30 = vmul.f32 %v102_v9, %v4317_v28  ;;  %v219_v32 = vmul.f32 %v103_v10, %v4319_v29 }
  0x5f   :  { %130 = vst.msk [vmem:[#allocation2 + $0xb8] sm:$0xff] %vm105_vm0, %v96_v48  ;;  %171 = vst.msk [vmem:[#allocation2 + $0x178] sm:$0xff] %vm105_vm0, %v154_v42  ;;  %3739 = vmatmul.mubr.msk.f32.gmra.mrb[4].mxu0 %vm105_vm0, %v243_v0  ;;  %v249_v31 = vld [vmem:[#allocation2 + $0x58] sm:$0xff]  ;;  %v250_v34 = vld [vmem:[#allocation2 + $0x60] sm:$0xff]  ;;  %v220_v35 = vmul.f32 %v104_v16, %v4336_v33 }
  0x60   :  { %190 = vst.msk [vmem:[#allocation2 + $0x188] sm:$0xff] %vm105_vm0, %v173_v43  ;;  %191 = vst.msk [vmem:[#allocation2 + $0x190] sm:$0xff] %vm105_vm0, %v174_v44  ;;  %3741 = vmatprep.mubr.msk.f32.mxu0 %vm105_vm0, %v244_v1  ;;  %v251_v27 = vld [vmem:[#allocation2 + $0x68] sm:$0xff]  ;;  %v252_v28 = vld [vmem:[#allocation2 + $0x70] sm:$0xff] }
  0x61   :  { %223 = vst.msk [vmem:[#allocation2 + $0x208] sm:$0xff] %vm105_vm0, %v206_v45  ;;  %192 = vst.msk [vmem:[#allocation2 + $0x198] sm:$0xff] %vm105_vm0, %v175_v49  ;;  %v253_v36 = vld [vmem:[#allocation2 + $0x78] sm:$0xff]  ;;  %v254_v37 = vld [vmem:[#allocation2 + $0x80] sm:$0xff] }
  0x62   :  { %193 = vst.msk [vmem:[#allocation2 + $0x1a0] sm:$0xff] %vm105_vm0, %v176_v50  ;;  %194 = vst.msk [vmem:[#allocation2 + $0x1a8] sm:$0xff] %vm105_vm0, %v177_v51  ;;  %v255_v29 = vld [vmem:[#allocation2 + $0x88] sm:$0xff]  ;;  %v256_v33 = vld [vmem:[#allocation2 + $0x90] sm:$0xff] }
  0x63   :  { %224 = vst.msk [vmem:[#allocation2 + $0x210] sm:$0xff] %vm105_vm0, %v207_v52  ;;  %195 = vst.msk [vmem:[#allocation2 + $0x1b0] sm:$0xff] %vm105_vm0, %v178_v55  ;;  %3742 = vmatmul.mubr.msk.f32.gmra.mrb[6].mxu0 %vm105_vm0, %v245_v15  ;;  %v257_v38 = vld [vmem:[#allocation2 + $0x98] sm:$0xff]  ;;  %v258_v39 = vld [vmem:[#allocation2 + $0xa0] sm:$0xff] }
  0x64   :  { %196 = vst.msk [vmem:[#allocation2 + $0x1b8] sm:$0xff] %vm105_vm0, %v179_v56  ;;  %225 = vst.msk [vmem:[#allocation2 + $0x218] sm:$0xff] %vm105_vm0, %v208_v57  ;;  %3744 = vmatprep.mubr.msk.f32.mxu0 %vm105_vm0, %v246_v21  ;;  %v259_v40 = vld [vmem:[#allocation2 + $0xa8] sm:$0xff]  ;;  %v270_v51 = vld [vmem:[#allocation2 + $0x100] sm:$0xff] }
  0x65   :  { %226 = vst.msk [vmem:[#allocation2 + $0x220] sm:$0xff] %vm105_vm0, %v209_v58  ;;  %227 = vst.msk [vmem:[#allocation2 + $0x228] sm:$0xff] %vm105_vm0, %v210_v59  ;;  %v260_v41 = vld [vmem:[#allocation2 + $0xb0] sm:$0xff]  ;;  %v271_v52 = vld [vmem:[#allocation2 + $0x108] sm:$0xff] }
  0x66   :  { %228 = vst.msk [vmem:[#allocation2 + $0x230] sm:$0xff] %vm105_vm0, %v211_v61  ;;  %229 = vst.msk [vmem:[#allocation2 + $0x238] sm:$0xff] %vm105_vm0, %v212_v63  ;;  %v261_v42 = vld [vmem:[#allocation2 + $0xb8] sm:$0xff]  ;;  %v272_v53 = vld [vmem:[#allocation2 + $0x110] sm:$0xff] }
  0x67   :  { %131 = vst.msk [vmem:[#allocation2 + $0xc0] sm:$0xff] %vm105_vm0, %v97_v2  ;;  %132 = vst.msk [vmem:[#allocation2 + $0xc8] sm:$0xff] %vm105_vm0, %v98_v3  ;;  %3745 = vmatmul.mubr.msk.f32.gmra.mrb[8].mxu0 %vm105_vm0, %v247_v22  ;;  %v273_v54 = vld [vmem:[#allocation2 + $0x118] sm:$0xff]  ;;  %v274_v55 = vld [vmem:[#allocation2 + $0x120] sm:$0xff] }
  0x68   :  { %133 = vst.msk [vmem:[#allocation2 + $0xd0] sm:$0xff] %vm105_vm0, %v99_v4  ;;  %134 = vst.msk [vmem:[#allocation2 + $0xd8] sm:$0xff] %vm105_vm0, %v100_v5  ;;  %3747 = vmatprep.mubr.msk.f32.mxu0 %vm105_vm0, %v248_v23  ;;  %v275_v56 = vld [vmem:[#allocation2 + $0x128] sm:$0xff]  ;;  %v276_v57 = vld [vmem:[#allocation2 + $0x130] sm:$0xff] }
  0x69   :  { %135 = vst.msk [vmem:[#allocation2 + $0xe0] sm:$0xff] %vm105_vm0, %v101_v8  ;;  %136 = vst.msk [vmem:[#allocation2 + $0xe8] sm:$0xff] %vm105_vm0, %v102_v9  ;;  %v277_v58 = vld [vmem:[#allocation2 + $0x138] sm:$0xff]  ;;  %v278_v59 = vld [vmem:[#allocation2 + $0x140] sm:$0xff] }
  0x6a   :  { %137 = vst.msk [vmem:[#allocation2 + $0xf0] sm:$0xff] %vm105_vm0, %v103_v10  ;;  %197 = vst.msk [vmem:[#allocation2 + $0x1c0] sm:$0xff] %vm105_vm0, %v180_v6  ;;  %v279_v60 = vld [vmem:[#allocation2 + $0x148] sm:$0xff]  ;;  %v280_v61 = vld [vmem:[#allocation2 + $0x150] sm:$0xff] }
  0x6b   :  { %230 = vst.msk [vmem:[#allocation2 + $0x240] sm:$0xff] %vm105_vm0, %v213_v7  ;;  %138 = vst.msk [vmem:[#allocation2 + $0xf8] sm:$0xff] %vm105_vm0, %v104_v16  ;;  %3748 = vmatmul.mubr.msk.f32.gmra.mrb[10].mxu0 %vm105_vm0, %v249_v31  ;;  %v281_v62 = vld [vmem:[#allocation2 + $0x158] sm:$0xff]  ;;  %v282_v63 = vld [vmem:[#allocation2 + $0x160] sm:$0xff] }
  0x6c   :  { %198 = vst.msk [vmem:[#allocation2 + $0x1c8] sm:$0xff] %vm105_vm0, %v181_v11  ;;  %199 = vst.msk [vmem:[#allocation2 + $0x1d0] sm:$0xff] %vm105_vm0, %v182_v12  ;;  %3750 = vmatprep.mubr.msk.f32.mxu0 %vm105_vm0, %v250_v34  ;;  %v283_v0 = vld [vmem:[#allocation2 + $0x168] sm:$0xff]  ;;  %v284_v1 = vld [vmem:[#allocation2 + $0x170] sm:$0xff] }
  0x6d   :  { %200 = vst.msk [vmem:[#allocation2 + $0x1d8] sm:$0xff] %vm105_vm0, %v183_v13  ;;  %231 = vst.msk [vmem:[#allocation2 + $0x248] sm:$0xff] %vm105_vm0, %v214_v14  ;;  %v285_v2 = vld [vmem:[#allocation2 + $0x178] sm:$0xff]  ;;  %v286_v3 = vld [vmem:[#allocation2 + $0x180] sm:$0xff] }
  0x6e   :  { %201 = vst.msk [vmem:[#allocation2 + $0x1e0] sm:$0xff] %vm105_vm0, %v184_v17  ;;  %202 = vst.msk [vmem:[#allocation2 + $0x1e8] sm:$0xff] %vm105_vm0, %v185_v18  ;;  %v262_v43 = vld [vmem:[#allocation2 + $0xc0] sm:$0xff]  ;;  %v263_v44 = vld [vmem:[#allocation2 + $0xc8] sm:$0xff] }
  0x6f   :  { %203 = vst.msk [vmem:[#allocation2 + $0x1f0] sm:$0xff] %vm105_vm0, %v186_v19  ;;  %232 = vst.msk [vmem:[#allocation2 + $0x250] sm:$0xff] %vm105_vm0, %v215_v20  ;;  %3751 = vmatmul.mubr.msk.f32.gmra.mrb[12].mxu0 %vm105_vm0, %v251_v27  ;;  %v264_v45 = vld [vmem:[#allocation2 + $0xd0] sm:$0xff]  ;;  %v265_v46 = vld [vmem:[#allocation2 + $0xd8] sm:$0xff] }
  0x70   :  { %204 = vst.msk [vmem:[#allocation2 + $0x1f8] sm:$0xff] %vm105_vm0, %v187_v24  ;;  %233 = vst.msk [vmem:[#allocation2 + $0x258] sm:$0xff] %vm105_vm0, %v216_v25  ;;  %3753 = vmatprep.mubr.msk.f32.mxu0 %vm105_vm0, %v252_v28  ;;  %v266_v47 = vld [vmem:[#allocation2 + $0xe0] sm:$0xff]  ;;  %v267_v48 = vld [vmem:[#allocation2 + $0xe8] sm:$0xff] }
  0x71   :  { %234 = vst.msk [vmem:[#allocation2 + $0x260] sm:$0xff] %vm105_vm0, %v217_v26  ;;  %235 = vst.msk [vmem:[#allocation2 + $0x268] sm:$0xff] %vm105_vm0, %v218_v30  ;;  %v268_v49 = vld [vmem:[#allocation2 + $0xf0] sm:$0xff]  ;;  %v287_v4 = vld [vmem:[#allocation2 + $0x188] sm:$0xff] }
  0x72   :  { %236 = vst.msk [vmem:[#allocation2 + $0x270] sm:$0xff] %vm105_vm0, %v219_v32  ;;  %237 = vst.msk [vmem:[#allocation2 + $0x278] sm:$0xff] %vm105_vm0, %v220_v35  ;;  %v269_v50 = vld [vmem:[#allocation2 + $0xf8] sm:$0xff]  ;;  %v288_v5 = vld [vmem:[#allocation2 + $0x190] sm:$0xff] }
  0x73   :  { %3754 = vmatmul.mubr.msk.f32.gmra.mrb[14].mxu0 %vm105_vm0, %v253_v36  ;;  %v289_v6 = vld [vmem:[#allocation2 + $0x198] sm:$0xff]  ;;  %v290_v7 = vld [vmem:[#allocation2 + $0x1a0] sm:$0xff]  ;;  %v291_v8 = vld [vmem:[#allocation2 + $0x1a8] sm:$0xff] }
  0x74   :  { %3756 = vmatprep.mubr.msk.f32.mxu0 %vm105_vm0, %v254_v37  ;;  %v292_v9 = vld [vmem:[#allocation2 + $0x1b0] sm:$0xff]  ;;  %v293_v10 = vld [vmem:[#allocation2 + $0x1b8] sm:$0xff]  ;;  %v294_v11 = vld [vmem:[#allocation2 + $0x1c0] sm:$0xff] }
  0x75   :  { %v295_v12 = vld [vmem:[#allocation2 + $0x1c8] sm:$0xff]  ;;  %v296_v13 = vld [vmem:[#allocation2 + $0x1d0] sm:$0xff]  ;;  %v297_v14 = vld [vmem:[#allocation2 + $0x1d8] sm:$0xff] }
  0x76   :  { %v298_v15 = vld [vmem:[#allocation2 + $0x1e0] sm:$0xff]  ;;  %v299_v16 = vld [vmem:[#allocation2 + $0x1e8] sm:$0xff]  ;;  %v300_v17 = vld [vmem:[#allocation2 + $0x1f0] sm:$0xff] }
  0x77   :  { %3757 = vmatmul.mubr.msk.f32.gmra.mrb[16].mxu0 %vm105_vm0, %v255_v29  ;;  %v301_v18 = vld [vmem:[#allocation2 + $0x1f8] sm:$0xff]  ;;  %v302_v19 = vld [vmem:[#allocation2 + $0x200] sm:$0xff]  ;;  %v303_v20 = vld [vmem:[#allocation2 + $0x208] sm:$0xff] }
  0x78   :  { %3759 = vmatprep.mubr.msk.f32.mxu0 %vm105_vm0, %v256_v33  ;;  %v304_v21 = vld [vmem:[#allocation2 + $0x210] sm:$0xff]  ;;  %v305_v24 = vld [vmem:[#allocation2 + $0x218] sm:$0xff]  ;;  %v306_v25 = vld [vmem:[#allocation2 + $0x220] sm:$0xff] }
  0x79   :  { %v307_v22 = vld [vmem:[#allocation2 + $0x228] sm:$0xff]  ;;  %v308_v26 = vld [vmem:[#allocation2 + $0x230] sm:$0xff]  ;;  %v309_v23 = vld [vmem:[#allocation2 + $0x238] sm:$0xff] }
  0x7a   :  { %v310_v30 = vld [vmem:[#allocation2 + $0x240] sm:$0xff]  ;;  %v311_v31 = vld [vmem:[#allocation2 + $0x248] sm:$0xff]  ;;  %v312_v32 = vld [vmem:[#allocation2 + $0x250] sm:$0xff] }
  0x7b   :  { %3760 = vmatmul.mubr.msk.f32.gmra.mrb[18].mxu0 %vm105_vm0, %v257_v38  ;;  %v313_v34 = vld [vmem:[#allocation2 + $0x258] sm:$0xff]  ;;  %v314_v35 = vld [vmem:[#allocation2 + $0x260] sm:$0xff]  ;;  %v315_v27 = vld [vmem:[#allocation2 + $0x268] sm:$0xff] }
  0x7c   :  { %3762 = vmatprep.mubr.msk.f32.mxu0 %vm105_vm0, %v258_v39  ;;  %v316_v28 = vld [vmem:[#allocation2 + $0x270] sm:$0xff]  ;;  %v317_v36 = vld [vmem:[#allocation2 + $0x278] sm:$0xff] }
  0x7d   :  { %v2305_v29 = vld [vmem:[#allocation6] sm:$0xff]  ;;  %v2306_v33 = vld [vmem:[#allocation6 + $0x8] sm:$0xff] }
  0x7e   :  { %v3980_v39 = vpack.c.bf16 %v2306_v33, %v2305_v29 }
  0x7f   :  { %3763 = vmatmul.mubr.msk.f32.gmra.mrb[20].mxu0 %vm105_vm0, %v259_v40 }
  0x80   :  { %3765 = vmatprep.mubr.msk.f32.mxu0 %vm105_vm0, %v260_v41  ;;  %3981 = vmatprep.subr.bf16.mxu1 %v3980_v39 }
  0x81   :  { %3983 = vmatpush3.bf16.msra.mxu1 %v3980_v39 }
  0x83   :  { %3766 = vmatmul.mubr.msk.f32.gmra.mrb[22].mxu0 %vm105_vm0, %v261_v42 }
  0x84   :  { %3768 = vmatprep.mubr.msk.f32.mxu0 %vm105_vm0, %v262_v43 }
  0x87   :  { %3769 = vmatmul.mubr.msk.f32.gmra.mrb[24].mxu0 %vm105_vm0, %v263_v44 }
  0x88   :  { %3771 = vmatprep.mubr.msk.f32.mxu0 %vm105_vm0, %v264_v45 }
  0x8b   :  { %3772 = vmatmul.mubr.msk.f32.gmra.mrb[26].mxu0 %vm105_vm0, %v265_v46 }
  0x8c   :  { %3774 = vmatprep.mubr.msk.f32.mxu0 %vm105_vm0, %v266_v47 }
  0x8f   :  { %3775 = vmatmul.mubr.msk.f32.gmra.mrb[28].mxu0 %vm105_vm0, %v267_v48 }
  0x90   :  { %3777 = vmatprep.mubr.msk.f32.mxu0 %vm105_vm0, %v268_v49 }
  0x93   :  { %3778 = vmatmul.mubr.msk.f32.gmra.mrb[30].mxu0 %vm105_vm0, %v269_v50 }
  0x94   :  { %3780 = vmatprep.mubr.msk.f32.mxu0 %vm105_vm0, %v270_v51 }
  0x97   :  { %3781 = vmatmul.mubr.msk.f32.gmra.mrb[32].mxu0 %vm105_vm0, %v271_v52 }
  0x98   :  { %3783 = vmatprep.mubr.msk.f32.mxu0 %vm105_vm0, %v272_v53 }
  0x9b   :  { %3784 = vmatmul.mubr.msk.f32.gmra.mrb[34].mxu0 %vm105_vm0, %v273_v54 }
  0x9c   :  { %3786 = vmatprep.mubr.msk.f32.mxu0 %vm105_vm0, %v274_v55 }
  0x9f   :  { %3787 = vmatmul.mubr.msk.f32.gmra.mrb[36].mxu0 %vm105_vm0, %v275_v56 }
  0xa0   :  { %3789 = vmatprep.mubr.msk.f32.mxu0 %vm105_vm0, %v276_v57 }
  0xa3   :  { %3790 = vmatmul.mubr.msk.f32.gmra.mrb[38].mxu0 %vm105_vm0, %v277_v58 }
  0xa4   :  { %3792 = vmatprep.mubr.msk.f32.mxu0 %vm105_vm0, %v278_v59 }
  0xa7   :  { %3793 = vmatmul.mubr.msk.f32.gmra.mrb[40].mxu0 %vm105_vm0, %v279_v60 }
  0xa8   :  { %3795 = vmatprep.mubr.msk.f32.mxu0 %vm105_vm0, %v280_v61 }
  0xab   :  { %3796 = vmatmul.mubr.msk.f32.gmra.mrb[42].mxu0 %vm105_vm0, %v281_v62 }
  0xac   :  { %3798 = vmatprep.mubr.msk.f32.mxu0 %vm105_vm0, %v282_v63 }
  0xaf   :  { %3799 = vmatmul.mubr.msk.f32.gmra.mrb[44].mxu0 %vm105_vm0, %v283_v0 }
  0xb0   :  { %3801 = vmatprep.mubr.msk.f32.mxu0 %vm105_vm0, %v284_v1 }
  0xb3   :  { %3802 = vmatmul.mubr.msk.f32.gmra.mrb[46].mxu0 %vm105_vm0, %v285_v2 }
  0xb4   :  { %3804 = vmatprep.mubr.msk.f32.mxu0 %vm105_vm0, %v286_v3 }
  0xb7   :  { %3805 = vmatmul.mubr.msk.f32.gmra.mrb[48].mxu0 %vm105_vm0, %v287_v4 }
  0xb8   :  { %3807 = vmatprep.mubr.msk.f32.mxu0 %vm105_vm0, %v288_v5 }
  0xbb   :  { %3808 = vmatmul.mubr.msk.f32.gmra.mrb[50].mxu0 %vm105_vm0, %v289_v6 }
  0xbc   :  { %3810 = vmatprep.mubr.msk.f32.mxu0 %vm105_vm0, %v290_v7 }
  0xbf   :  { %3811 = vmatmul.mubr.msk.f32.gmra.mrb[52].mxu0 %vm105_vm0, %v291_v8 }
  0xc0   :  { %3813 = vmatprep.mubr.msk.f32.mxu0 %vm105_vm0, %v292_v9 }
  0xc3   :  { %3814 = vmatmul.mubr.msk.f32.gmra.mrb[54].mxu0 %vm105_vm0, %v293_v10 }
  0xc4   :  { %3816 = vmatprep.mubr.msk.f32.mxu0 %vm105_vm0, %v294_v11 }
  0xc7   :  { %3817 = vmatmul.mubr.msk.f32.gmra.mrb[56].mxu0 %vm105_vm0, %v295_v12 }
  0xc8   :  { %3819 = vmatprep.mubr.msk.f32.mxu0 %vm105_vm0, %v296_v13 }
  0xcb   :  { %3820 = vmatmul.mubr.msk.f32.gmra.mrb[58].mxu0 %vm105_vm0, %v297_v14 }
  0xcc   :  { %3822 = vmatprep.mubr.msk.f32.mxu0 %vm105_vm0, %v298_v15 }
  0xcf   :  { %3823 = vmatmul.mubr.msk.f32.gmra.mrb[60].mxu0 %vm105_vm0, %v299_v16 }
  0xd0   :  { %3825 = vmatprep.mubr.msk.f32.mxu0 %vm105_vm0, %v300_v17 }
  0xd3   :  { %3826 = vmatmul.mubr.msk.f32.gmra.mrb[62].mxu0 %vm105_vm0, %v301_v18 }
  0xd4   :  { %3828 = vmatprep.mubr.msk.f32.mxu0 %vm105_vm0, %v302_v19 }
  0xd7   :  { %3829 = vmatmul.mubr.msk.f32.gmra.mrb[64].mxu0 %vm105_vm0, %v303_v20 }
  0xd8   :  { %3831 = vmatprep.mubr.msk.f32.mxu0 %vm105_vm0, %v304_v21 }
  0xdb   :  { %3832 = vmatmul.mubr.msk.f32.gmra.mrb[66].mxu0 %vm105_vm0, %v305_v24 }
  0xdc   :  { %3834 = vmatprep.mubr.msk.f32.mxu0 %vm105_vm0, %v306_v25 }
  0xdf   :  { %3835 = vmatmul.mubr.msk.f32.gmra.mrb[68].mxu0 %vm105_vm0, %v307_v22 }
  0xe0   :  { %3837 = vmatprep.mubr.msk.f32.mxu0 %vm105_vm0, %v308_v26 }
  0xe3   :  { %3838 = vmatmul.mubr.msk.f32.gmra.mrb[70].mxu0 %vm105_vm0, %v309_v23 }
  0xe4   :  { %3840 = vmatprep.mubr.msk.f32.mxu0 %vm105_vm0, %v310_v30 }
  0xe7   :  { %3841 = vmatmul.mubr.msk.f32.gmra.mrb[72].mxu0 %vm105_vm0, %v311_v31 }
  0xe8   :  { %3843 = vmatprep.mubr.msk.f32.mxu0 %vm105_vm0, %v312_v32 }
  0xeb   :  { %3844 = vmatmul.mubr.msk.f32.gmra.mrb[74].mxu0 %vm105_vm0, %v313_v34 }
  0xec   :  { %3846 = vmatprep.mubr.msk.f32.mxu0 %vm105_vm0, %v314_v35 }
  0xef   :  { %3847 = vmatmul.mubr.msk.f32.gmra.mrb[76].mxu0 %vm105_vm0, %v315_v27 }
  0xf0   :  { %3849 = vmatprep.mubr.msk.f32.mxu0 %vm105_vm0, %v316_v28 }
  0xf3   :  { %3850 = vmatmul.mubr.msk.f32.gmra.mrb[78].mxu0 %vm105_vm0, %v317_v36 }
 0x12a   :  { %v3734_v37 = vpop.f32.mrb[0].mxu0 }
 0x12b   :  { %v626_v38 = vpop.f32.mrb[1].mxu0 }
 0x12c   :  { %1025 = vxpose.xlu0.b32.start [1/2] (short) (narrow) %v626_v38, 16 }
 0x12e   :  { %v3737_v40 = vpop.f32.mrb[2].mxu0 }
 0x12f   :  { %v636_v41 = vpop.f32.mrb[3].mxu0 }
 0x130   :  { %1026 = vxpose.xlu0.b32.end [2/2] (short) (narrow) %v3734_v37, 16  ;;  %1057 = vxpose.xlu1.b32.start [1/2] (short) (narrow) %v636_v41, 16 }
 0x132   :  { %v3740_v42 = vpop.f32.mrb[4].mxu0 }
 0x133   :  { %v646_v43 = vpop.f32.mrb[5].mxu0 }
 0x134   :  { %1058 = vxpose.xlu1.b32.end [2/2] (short) (narrow) %v3737_v40, 16  ;;  %1089 = vxpose.xlu0.b32.start [1/2] (short) (narrow) %v646_v43, 16 }
 0x136   :  { %v3743_v44 = vpop.f32.mrb[6].mxu0 }
 0x137   :  { %v656_v45 = vpop.f32.mrb[7].mxu0 }
 0x138   :  { %1090 = vxpose.xlu0.b32.end [2/2] (short) (narrow) %v3740_v42, 16  ;;  %1121 = vxpose.xlu1.b32.start [1/2] (short) (narrow) %v656_v45, 16 }
 0x13a   :  { %v3746_v46 = vpop.f32.mrb[8].mxu0 }
 0x13b   :  { %v666_v47 = vpop.f32.mrb[9].mxu0 }
 0x13c   :  { %1122 = vxpose.xlu1.b32.end [2/2] (short) (narrow) %v3743_v44, 16  ;;  %1153 = vxpose.xlu0.b32.start [1/2] (short) (narrow) %v666_v47, 16 }
 0x13e   :  { %v3749_v48 = vpop.f32.mrb[10].mxu0 }
 0x13f   :  { %v676_v49 = vpop.f32.mrb[11].mxu0 }
 0x140   :  { %1154 = vxpose.xlu0.b32.end [2/2] (short) (narrow) %v3746_v46, 16  ;;  %1185 = vxpose.xlu1.b32.start [1/2] (short) (narrow) %v676_v49, 16 }
 0x142   :  { %v3752_v50 = vpop.f32.mrb[12].mxu0 }
 0x143   :  { %v686_v51 = vpop.f32.mrb[13].mxu0 }
 0x144   :  { %1186 = vxpose.xlu1.b32.end [2/2] (short) (narrow) %v3749_v48, 16  ;;  %1217 = vxpose.xlu0.b32.start [1/2] (short) (narrow) %v686_v51, 16 }
 0x146   :  { %v3755_v52 = vpop.f32.mrb[14].mxu0 }
 0x147   :  { %v696_v53 = vpop.f32.mrb[15].mxu0 }
 0x148   :  { %1218 = vxpose.xlu0.b32.end [2/2] (short) (narrow) %v3752_v50, 16  ;;  %1249 = vxpose.xlu1.b32.start [1/2] (short) (narrow) %v696_v53, 16 }
 0x14a   :  { %v3758_v54 = vpop.f32.mrb[16].mxu0 }
 0x14b   :  { %v706_v55 = vpop.f32.mrb[17].mxu0 }
 0x14c   :  { %1250 = vxpose.xlu1.b32.end [2/2] (short) (narrow) %v3755_v52, 16  ;;  %1281 = vxpose.xlu0.b32.start [1/2] (short) (narrow) %v706_v55, 16 }
 0x14e   :  { %v3761_v56 = vpop.f32.mrb[18].mxu0 }
 0x14f   :  { %v716_v57 = vpop.f32.mrb[19].mxu0 }
 0x150   :  { %1282 = vxpose.xlu0.b32.end [2/2] (short) (narrow) %v3758_v54, 16  ;;  %1313 = vxpose.xlu1.b32.start [1/2] (short) (narrow) %v716_v57, 16 }
 0x152   :  { %v3764_v58 = vpop.f32.mrb[20].mxu0 }
 0x153   :  { %v726_v59 = vpop.f32.mrb[21].mxu0 }
 0x154   :  { %1314 = vxpose.xlu1.b32.end [2/2] (short) (narrow) %v3761_v56, 16  ;;  %1345 = vxpose.xlu0.b32.start [1/2] (short) (narrow) %v726_v59, 16 }
 0x156   :  { %v3767_v60 = vpop.f32.mrb[22].mxu0 }
 0x157   :  { %v736_v61 = vpop.f32.mrb[23].mxu0 }
 0x158   :  { %1346 = vxpose.xlu0.b32.end [2/2] (short) (narrow) %v3764_v58, 16  ;;  %1377 = vxpose.xlu1.b32.start [1/2] (short) (narrow) %v736_v61, 16 }
 0x15a   :  { %v3770_v62 = vpop.f32.mrb[24].mxu0 }
 0x15b   :  { %v746_v63 = vpop.f32.mrb[25].mxu0 }
 0x15c   :  { %1378 = vxpose.xlu1.b32.end [2/2] (short) (narrow) %v3767_v60, 16  ;;  %1409 = vxpose.xlu0.b32.start [1/2] (short) (narrow) %v746_v63, 16 }
 0x15e   :  { %v3773_v0 = vpop.f32.mrb[26].mxu0 }
 0x15f   :  { %v756_v1 = vpop.f32.mrb[27].mxu0 }
 0x160   :  { %1410 = vxpose.xlu0.b32.end [2/2] (short) (narrow) %v3770_v62, 16  ;;  %1441 = vxpose.xlu1.b32.start [1/2] (short) (narrow) %v756_v1, 16 }
 0x162   :  { %v3776_v2 = vpop.f32.mrb[28].mxu0 }
 0x163   :  { %v766_v3 = vpop.f32.mrb[29].mxu0 }
 0x164   :  { %1442 = vxpose.xlu1.b32.end [2/2] (short) (narrow) %v3773_v0, 16  ;;  %1473 = vxpose.xlu0.b32.start [1/2] (short) (narrow) %v766_v3, 16 }
 0x166   :  { %v3779_v4 = vpop.f32.mrb[30].mxu0 }
 0x167   :  { %v776_v5 = vpop.f32.mrb[31].mxu0 }
 0x168   :  { %1474 = vxpose.xlu0.b32.end [2/2] (short) (narrow) %v3776_v2, 16  ;;  %1505 = vxpose.xlu1.b32.start [1/2] (short) (narrow) %v776_v5, 16 }
 0x16a   :  { %v3782_v6 = vpop.f32.mrb[32].mxu0 }
 0x16b   :  { %v786_v7 = vpop.f32.mrb[33].mxu0 }
 0x16c   :  { %1506 = vxpose.xlu1.b32.end [2/2] (short) (narrow) %v3779_v4, 16  ;;  %1537 = vxpose.xlu0.b32.start [1/2] (short) (narrow) %v786_v7, 16 }
 0x16e   :  { %v3785_v8 = vpop.f32.mrb[34].mxu0 }
 0x16f   :  { %v796_v9 = vpop.f32.mrb[35].mxu0 }
 0x170   :  { %1538 = vxpose.xlu0.b32.end [2/2] (short) (narrow) %v3782_v6, 16  ;;  %1569 = vxpose.xlu1.b32.start [1/2] (short) (narrow) %v796_v9, 16 }
 0x172   :  { %v3788_v10 = vpop.f32.mrb[36].mxu0 }
 0x173   :  { %v806_v11 = vpop.f32.mrb[37].mxu0 }
 0x174   :  { %1570 = vxpose.xlu1.b32.end [2/2] (short) (narrow) %v3785_v8, 16  ;;  %1601 = vxpose.xlu0.b32.start [1/2] (short) (narrow) %v806_v11, 16 }
 0x176   :  { %v3791_v12 = vpop.f32.mrb[38].mxu0 }
 0x177   :  { %v816_v13 = vpop.f32.mrb[39].mxu0 }
 0x178   :  { %1602 = vxpose.xlu0.b32.end [2/2] (short) (narrow) %v3788_v10, 16  ;;  %1633 = vxpose.xlu1.b32.start [1/2] (short) (narrow) %v816_v13, 16 }
 0x17a   :  { %v3794_v14 = vpop.f32.mrb[40].mxu0 }
 0x17b   :  { %v826_v15 = vpop.f32.mrb[41].mxu0 }
 0x17c   :  { %1634 = vxpose.xlu1.b32.end [2/2] (short) (narrow) %v3791_v12, 16  ;;  %1665 = vxpose.xlu0.b32.start [1/2] (short) (narrow) %v826_v15, 16 }
 0x17e   :  { %v3797_v16 = vpop.f32.mrb[42].mxu0 }
 0x17f   :  { %v836_v17 = vpop.f32.mrb[43].mxu0 }
 0x180   :  { %1666 = vxpose.xlu0.b32.end [2/2] (short) (narrow) %v3794_v14, 16  ;;  %1697 = vxpose.xlu1.b32.start [1/2] (short) (narrow) %v836_v17, 16 }
 0x182   :  { %v3800_v18 = vpop.f32.mrb[44].mxu0 }
 0x183   :  { %v846_v19 = vpop.f32.mrb[45].mxu0 }
 0x184   :  { %1698 = vxpose.xlu1.b32.end [2/2] (short) (narrow) %v3797_v16, 16  ;;  %1729 = vxpose.xlu0.b32.start [1/2] (short) (narrow) %v846_v19, 16 }
 0x186   :  { %v3803_v20 = vpop.f32.mrb[46].mxu0 }
 0x187   :  { %v856_v21 = vpop.f32.mrb[47].mxu0 }
 0x188   :  { %1730 = vxpose.xlu0.b32.end [2/2] (short) (narrow) %v3800_v18, 16  ;;  %1761 = vxpose.xlu1.b32.start [1/2] (short) (narrow) %v856_v21, 16 }
 0x18a   :  { %v3806_v24 = vpop.f32.mrb[48].mxu0 }
 0x18b   :  { %v866_v25 = vpop.f32.mrb[49].mxu0 }
 0x18c   :  { %1762 = vxpose.xlu1.b32.end [2/2] (short) (narrow) %v3803_v20, 16  ;;  %1793 = vxpose.xlu0.b32.start [1/2] (short) (narrow) %v866_v25, 16 }
 0x18e   :  { %v3809_v22 = vpop.f32.mrb[50].mxu0 }
 0x18f   :  { %v876_v26 = vpop.f32.mrb[51].mxu0 }
 0x190   :  { %1794 = vxpose.xlu0.b32.end [2/2] (short) (narrow) %v3806_v24, 16  ;;  %1825 = vxpose.xlu1.b32.start [1/2] (short) (narrow) %v876_v26, 16 }
 0x192   :  { %v3812_v23 = vpop.f32.mrb[52].mxu0 }
 0x193   :  { %v886_v30 = vpop.f32.mrb[53].mxu0 }
 0x194   :  { %1826 = vxpose.xlu1.b32.end [2/2] (short) (narrow) %v3809_v22, 16  ;;  %1857 = vxpose.xlu0.b32.start [1/2] (short) (narrow) %v886_v30, 16 }
 0x196   :  { %v3815_v31 = vpop.f32.mrb[54].mxu0 }
 0x197   :  { %v896_v32 = vpop.f32.mrb[55].mxu0 }
 0x198   :  { %1858 = vxpose.xlu0.b32.end [2/2] (short) (narrow) %v3812_v23, 16  ;;  %1889 = vxpose.xlu1.b32.start [1/2] (short) (narrow) %v896_v32, 16 }
 0x19a   :  { %v3818_v34 = vpop.f32.mrb[56].mxu0 }
 0x19b   :  { %v906_v35 = vpop.f32.mrb[57].mxu0 }
 0x19c   :  { %1890 = vxpose.xlu1.b32.end [2/2] (short) (narrow) %v3815_v31, 16  ;;  %1921 = vxpose.xlu0.b32.start [1/2] (short) (narrow) %v906_v35, 16 }
 0x19e   :  { %v3821_v27 = vpop.f32.mrb[58].mxu0 }
 0x19f   :  { %v916_v28 = vpop.f32.mrb[59].mxu0 }
 0x1a0   :  { %1922 = vxpose.xlu0.b32.end [2/2] (short) (narrow) %v3818_v34, 16  ;;  %1953 = vxpose.xlu1.b32.start [1/2] (short) (narrow) %v916_v28, 16 }
 0x1a2   :  { %v3824_v36 = vpop.f32.mrb[60].mxu0 }
 0x1a3   :  { %v926_v37 = vpop.f32.mrb[61].mxu0 }
 0x1a4   :  { %1954 = vxpose.xlu1.b32.end [2/2] (short) (narrow) %v3821_v27, 16  ;;  %1985 = vxpose.xlu0.b32.start [1/2] (short) (narrow) %v926_v37, 16 }
 0x1a6   :  { %v3827_v29 = vpop.f32.mrb[62].mxu0 }
 0x1a7   :  { %v936_v33 = vpop.f32.mrb[63].mxu0 }
 0x1a8   :  { %1986 = vxpose.xlu0.b32.end [2/2] (short) (narrow) %v3824_v36, 16  ;;  %2017 = vxpose.xlu1.b32.start [1/2] (short) (narrow) %v936_v33, 16 }
 0x1aa   :  { %v3830_v38 = vpop.f32.mrb[64].mxu0 }
 0x1ab   :  { %v946_v39 = vpop.f32.mrb[65].mxu0 }
 0x1ac   :  { %v1041_v40 = vpop.trf.xlu0  ;;  %2018 = vxpose.xlu1.b32.end [2/2] (short) (narrow) %v3827_v29, 16  ;;  %2049 = vxpose.xlu0.b32.start [1/2] (short) (narrow) %v946_v39, 16 }
 0x1ad   :  { %3856 = vmatprep.mubr.msk.f32.mxu1 %vm105_vm0, %v1041_v40 }
 0x1ae   :  { %v3833_v41 = vpop.f32.mrb[66].mxu0 }
 0x1af   :  { %v956_v42 = vpop.f32.mrb[67].mxu0 }
 0x1b0   :  { %v1042_v43 = vpop.trf.xlu0  ;;  %v1073_v44 = vpop.trf.xlu1  ;;  %2050 = vxpose.xlu0.b32.end [2/2] (short) (narrow) %v3830_v38, 16  ;;  %2081 = vxpose.xlu1.b32.start [1/2] (short) (narrow) %v956_v42, 16 }
 0x1b1   :  { %3857 = vmatmul.mubr.msk.f32.vlgmr.msra.gmra.mrb[0].mxu1 %vm105_vm0, %v1042_v43 }
 0x1b2   :  { %v3836_v45 = vpop.f32.mrb[68].mxu0  ;;  %3859 = vmatprep.mubr.msk.f32.mxu1 %vm105_vm0, %v1073_v44 }
 0x1b3   :  { %v966_v46 = vpop.f32.mrb[69].mxu0 }
 0x1b4   :  { %v1074_v47 = vpop.trf.xlu1  ;;  %v1105_v48 = vpop.trf.xlu0  ;;  %2082 = vxpose.xlu1.b32.end [2/2] (short) (narrow) %v3833_v41, 16  ;;  %2113 = vxpose.xlu0.b32.start [1/2] (short) (narrow) %v966_v46, 16 }
 0x1b5   :  { %3860 = vmatmul.mubr.msk.f32.gmra.mrb[2].mxu1 %vm105_vm0, %v1074_v47 }
 0x1b6   :  { %v3839_v49 = vpop.f32.mrb[70].mxu0  ;;  %3862 = vmatprep.mubr.msk.f32.mxu1 %vm105_vm0, %v1105_v48 }
 0x1b7   :  { %v976_v50 = vpop.f32.mrb[71].mxu0 }
 0x1b8   :  { %v1106_v51 = vpop.trf.xlu0  ;;  %v1137_v52 = vpop.trf.xlu1  ;;  %2114 = vxpose.xlu0.b32.end [2/2] (short) (narrow) %v3836_v45, 16  ;;  %2145 = vxpose.xlu1.b32.start [1/2] (short) (narrow) %v976_v50, 16 }
 0x1b9   :  { %3863 = vmatmul.mubr.msk.f32.gmra.mrb[4].mxu1 %vm105_vm0, %v1106_v51 }
 0x1ba   :  { %v3842_v53 = vpop.f32.mrb[72].mxu0  ;;  %3865 = vmatprep.mubr.msk.f32.mxu1 %vm105_vm0, %v1137_v52 }
 0x1bb   :  { %v986_v54 = vpop.f32.mrb[73].mxu0 }
 0x1bc   :  { %v1138_v55 = vpop.trf.xlu1  ;;  %v1169_v56 = vpop.trf.xlu0  ;;  %2146 = vxpose.xlu1.b32.end [2/2] (short) (narrow) %v3839_v49, 16  ;;  %2177 = vxpose.xlu0.b32.start [1/2] (short) (narrow) %v986_v54, 16 }
 0x1bd   :  { %3866 = vmatmul.mubr.msk.f32.gmra.mrb[6].mxu1 %vm105_vm0, %v1138_v55 }
 0x1be   :  { %v3845_v57 = vpop.f32.mrb[74].mxu0  ;;  %3868 = vmatprep.mubr.msk.f32.mxu1 %vm105_vm0, %v1169_v56 }
 0x1bf   :  { %v996_v58 = vpop.f32.mrb[75].mxu0 }
 0x1c0   :  { %v1170_v59 = vpop.trf.xlu0  ;;  %v1201_v60 = vpop.trf.xlu1  ;;  %2178 = vxpose.xlu0.b32.end [2/2] (short) (narrow) %v3842_v53, 16  ;;  %2209 = vxpose.xlu1.b32.start [1/2] (short) (narrow) %v996_v58, 16 }
 0x1c1   :  { %3869 = vmatmul.mubr.msk.f32.gmra.mrb[8].mxu1 %vm105_vm0, %v1170_v59 }
 0x1c2   :  { %v3848_v61 = vpop.f32.mrb[76].mxu0  ;;  %3871 = vmatprep.mubr.msk.f32.mxu1 %vm105_vm0, %v1201_v60 }
 0x1c3   :  { %v1006_v62 = vpop.f32.mrb[77].mxu0 }
 0x1c4   :  { %v1202_v63 = vpop.trf.xlu1  ;;  %v1233_v0 = vpop.trf.xlu0  ;;  %2210 = vxpose.xlu1.b32.end [2/2] (short) (narrow) %v3845_v57, 16  ;;  %2241 = vxpose.xlu0.b32.start [1/2] (short) (narrow) %v1006_v62, 16 }
 0x1c5   :  { %3872 = vmatmul.mubr.msk.f32.gmra.mrb[10].mxu1 %vm105_vm0, %v1202_v63 }
 0x1c6   :  { %v3851_v1 = vpop.f32.mrb[78].mxu0  ;;  %3874 = vmatprep.mubr.msk.f32.mxu1 %vm105_vm0, %v1233_v0 }
 0x1c7   :  { %v1016_v2 = vpop.f32.mrb[79].mxu0 }
 0x1c8   :  { %v1234_v3 = vpop.trf.xlu0  ;;  %v1265_v4 = vpop.trf.xlu1  ;;  %2242 = vxpose.xlu0.b32.end [2/2] (short) (narrow) %v3848_v61, 16  ;;  %2273 = vxpose.xlu1.b32.start [1/2] (short) (narrow) %v1016_v2, 16 }
 0x1c9   :  { %3875 = vmatmul.mubr.msk.f32.gmra.mrb[12].mxu1 %vm105_vm0, %v1234_v3 }
 0x1ca   :  { %3877 = vmatprep.mubr.msk.f32.mxu1 %vm105_vm0, %v1265_v4 }
 0x1cc   :  { %v1266_v5 = vpop.trf.xlu1  ;;  %v1297_v6 = vpop.trf.xlu0  ;;  %2274 = vxpose.xlu1.b32.end [2/2] (short) (narrow) %v3851_v1, 16 }
 0x1cd   :  { %3878 = vmatmul.mubr.msk.f32.gmra.mrb[14].mxu1 %vm105_vm0, %v1266_v5 }
 0x1ce   :  { %3880 = vmatprep.mubr.msk.f32.mxu1 %vm105_vm0, %v1297_v6 }
 0x1d0   :  { %v1298_v7 = vpop.trf.xlu0  ;;  %v1329_v8 = vpop.trf.xlu1 }
 0x1d1   :  { %3881 = vmatmul.mubr.msk.f32.gmra.mrb[16].mxu1 %vm105_vm0, %v1298_v7 }
 0x1d2   :  { %3883 = vmatprep.mubr.msk.f32.mxu1 %vm105_vm0, %v1329_v8 }
 0x1d4   :  { %v1330_v9 = vpop.trf.xlu1  ;;  %v1361_v10 = vpop.trf.xlu0 }
 0x1d5   :  { %3884 = vmatmul.mubr.msk.f32.gmra.mrb[18].mxu1 %vm105_vm0, %v1330_v9 }
 0x1d6   :  { %3886 = vmatprep.mubr.msk.f32.mxu1 %vm105_vm0, %v1361_v10 }
 0x1d8   :  { %v1362_v11 = vpop.trf.xlu0  ;;  %v1393_v12 = vpop.trf.xlu1 }
 0x1d9   :  { %3887 = vmatmul.mubr.msk.f32.gmra.mrb[20].mxu1 %vm105_vm0, %v1362_v11 }
 0x1da   :  { %3889 = vmatprep.mubr.msk.f32.mxu1 %vm105_vm0, %v1393_v12 }
 0x1dc   :  { %v1394_v13 = vpop.trf.xlu1  ;;  %v1425_v14 = vpop.trf.xlu0 }
 0x1dd   :  { %3890 = vmatmul.mubr.msk.f32.gmra.mrb[22].mxu1 %vm105_vm0, %v1394_v13 }
 0x1de   :  { %3892 = vmatprep.mubr.msk.f32.mxu1 %vm105_vm0, %v1425_v14 }
 0x1e0   :  { %v1426_v15 = vpop.trf.xlu0  ;;  %v1457_v16 = vpop.trf.xlu1 }
 0x1e1   :  { %3893 = vmatmul.mubr.msk.f32.gmra.mrb[24].mxu1 %vm105_vm0, %v1426_v15 }
 0x1e2   :  { %3895 = vmatprep.mubr.msk.f32.mxu1 %vm105_vm0, %v1457_v16 }
 0x1e4   :  { %v1458_v17 = vpop.trf.xlu1  ;;  %v1489_v18 = vpop.trf.xlu0 }
 0x1e5   :  { %3896 = vmatmul.mubr.msk.f32.gmra.mrb[26].mxu1 %vm105_vm0, %v1458_v17 }
 0x1e6   :  { %3898 = vmatprep.mubr.msk.f32.mxu1 %vm105_vm0, %v1489_v18 }
 0x1e8   :  { %v1490_v19 = vpop.trf.xlu0  ;;  %v1521_v20 = vpop.trf.xlu1 }
 0x1e9   :  { %3899 = vmatmul.mubr.msk.f32.gmra.mrb[28].mxu1 %vm105_vm0, %v1490_v19 }
 0x1ea   :  { %3901 = vmatprep.mubr.msk.f32.mxu1 %vm105_vm0, %v1521_v20 }
 0x1ec   :  { %v1522_v21 = vpop.trf.xlu1  ;;  %v1553_v24 = vpop.trf.xlu0 }
 0x1ed   :  { %3902 = vmatmul.mubr.msk.f32.gmra.mrb[30].mxu1 %vm105_vm0, %v1522_v21 }
 0x1ee   :  { %3904 = vmatprep.mubr.msk.f32.mxu1 %vm105_vm0, %v1553_v24 }
 0x1f0   :  { %v1554_v25 = vpop.trf.xlu0  ;;  %v1585_v22 = vpop.trf.xlu1 }
 0x1f1   :  { %3905 = vmatmul.mubr.msk.f32.gmra.mrb[32].mxu1 %vm105_vm0, %v1554_v25 }
 0x1f2   :  { %3907 = vmatprep.mubr.msk.f32.mxu1 %vm105_vm0, %v1585_v22 }
 0x1f4   :  { %v1586_v26 = vpop.trf.xlu1  ;;  %v1617_v23 = vpop.trf.xlu0 }
 0x1f5   :  { %3908 = vmatmul.mubr.msk.f32.gmra.mrb[34].mxu1 %vm105_vm0, %v1586_v26 }
 0x1f6   :  { %3910 = vmatprep.mubr.msk.f32.mxu1 %vm105_vm0, %v1617_v23 }
 0x1f8   :  { %v1618_v30 = vpop.trf.xlu0  ;;  %v1649_v31 = vpop.trf.xlu1 }
 0x1f9   :  { %3911 = vmatmul.mubr.msk.f32.gmra.mrb[36].mxu1 %vm105_vm0, %v1618_v30 }
 0x1fa   :  { %3913 = vmatprep.mubr.msk.f32.mxu1 %vm105_vm0, %v1649_v31 }
 0x1fc   :  { %v1650_v32 = vpop.trf.xlu1  ;;  %v1681_v34 = vpop.trf.xlu0 }
 0x1fd   :  { %3914 = vmatmul.mubr.msk.f32.gmra.mrb[38].mxu1 %vm105_vm0, %v1650_v32 }
 0x1fe   :  { %3916 = vmatprep.mubr.msk.f32.mxu1 %vm105_vm0, %v1681_v34 }
 0x200   :  { %v1682_v35 = vpop.trf.xlu0  ;;  %v1713_v27 = vpop.trf.xlu1 }
 0x201   :  { %3917 = vmatmul.mubr.msk.f32.gmra.mrb[40].mxu1 %vm105_vm0, %v1682_v35 }
 0x202   :  { %3919 = vmatprep.mubr.msk.f32.mxu1 %vm105_vm0, %v1713_v27 }
 0x204   :  { %v1714_v28 = vpop.trf.xlu1  ;;  %v1745_v36 = vpop.trf.xlu0 }
 0x205   :  { %3920 = vmatmul.mubr.msk.f32.gmra.mrb[42].mxu1 %vm105_vm0, %v1714_v28 }
 0x206   :  { %3922 = vmatprep.mubr.msk.f32.mxu1 %vm105_vm0, %v1745_v36 }
 0x208   :  { %v1746_v37 = vpop.trf.xlu0  ;;  %v1777_v29 = vpop.trf.xlu1 }
 0x209   :  { %3923 = vmatmul.mubr.msk.f32.gmra.mrb[44].mxu1 %vm105_vm0, %v1746_v37 }
 0x20a   :  { %3925 = vmatprep.mubr.msk.f32.mxu1 %vm105_vm0, %v1777_v29 }
 0x20c   :  { %v1778_v33 = vpop.trf.xlu1  ;;  %v1809_v38 = vpop.trf.xlu0 }
 0x20d   :  { %3926 = vmatmul.mubr.msk.f32.gmra.mrb[46].mxu1 %vm105_vm0, %v1778_v33 }
 0x20e   :  { %3928 = vmatprep.mubr.msk.f32.mxu1 %vm105_vm0, %v1809_v38 }
 0x210   :  { %v1810_v39 = vpop.trf.xlu0  ;;  %v1841_v40 = vpop.trf.xlu1 }
 0x211   :  { %3929 = vmatmul.mubr.msk.f32.gmra.mrb[48].mxu1 %vm105_vm0, %v1810_v39 }
 0x212   :  { %3931 = vmatprep.mubr.msk.f32.mxu1 %vm105_vm0, %v1841_v40 }
 0x214   :  { %v1842_v41 = vpop.trf.xlu1  ;;  %v1873_v42 = vpop.trf.xlu0 }
 0x215   :  { %3932 = vmatmul.mubr.msk.f32.gmra.mrb[50].mxu1 %vm105_vm0, %v1842_v41 }
 0x216   :  { %3934 = vmatprep.mubr.msk.f32.mxu1 %vm105_vm0, %v1873_v42 }
 0x218   :  { %v1874_v43 = vpop.trf.xlu0  ;;  %v1905_v44 = vpop.trf.xlu1 }
 0x219   :  { %3935 = vmatmul.mubr.msk.f32.gmra.mrb[52].mxu1 %vm105_vm0, %v1874_v43 }
 0x21a   :  { %3937 = vmatprep.mubr.msk.f32.mxu1 %vm105_vm0, %v1905_v44 }
 0x21c   :  { %v1906_v45 = vpop.trf.xlu1  ;;  %v1937_v46 = vpop.trf.xlu0 }
 0x21d   :  { %3938 = vmatmul.mubr.msk.f32.gmra.mrb[54].mxu1 %vm105_vm0, %v1906_v45 }
 0x21e   :  { %3940 = vmatprep.mubr.msk.f32.mxu1 %vm105_vm0, %v1937_v46 }
 0x220   :  { %v1938_v47 = vpop.trf.xlu0  ;;  %v1969_v48 = vpop.trf.xlu1 }
 0x221   :  { %3941 = vmatmul.mubr.msk.f32.gmra.mrb[56].mxu1 %vm105_vm0, %v1938_v47 }
 0x222   :  { %3943 = vmatprep.mubr.msk.f32.mxu1 %vm105_vm0, %v1969_v48 }
 0x224   :  { %v1970_v49 = vpop.trf.xlu1  ;;  %v2001_v50 = vpop.trf.xlu0 }
 0x225   :  { %3944 = vmatmul.mubr.msk.f32.gmra.mrb[58].mxu1 %vm105_vm0, %v1970_v49 }
 0x226   :  { %3946 = vmatprep.mubr.msk.f32.mxu1 %vm105_vm0, %v2001_v50 }
 0x228   :  { %v2002_v51 = vpop.trf.xlu0  ;;  %v2033_v52 = vpop.trf.xlu1 }
 0x229   :  { %3947 = vmatmul.mubr.msk.f32.gmra.mrb[60].mxu1 %vm105_vm0, %v2002_v51 }
 0x22a   :  { %3949 = vmatprep.mubr.msk.f32.mxu1 %vm105_vm0, %v2033_v52 }
 0x22c   :  { %v2034_v53 = vpop.trf.xlu1  ;;  %v2065_v54 = vpop.trf.xlu0 }
 0x22d   :  { %3950 = vmatmul.mubr.msk.f32.gmra.mrb[62].mxu1 %vm105_vm0, %v2034_v53 }
 0x22e   :  { %3952 = vmatprep.mubr.msk.f32.mxu1 %vm105_vm0, %v2065_v54 }
 0x230   :  { %v2066_v55 = vpop.trf.xlu0  ;;  %v2097_v56 = vpop.trf.xlu1 }
 0x231   :  { %3953 = vmatmul.mubr.msk.f32.gmra.mrb[64].mxu1 %vm105_vm0, %v2066_v55 }
 0x232   :  { %3955 = vmatprep.mubr.msk.f32.mxu1 %vm105_vm0, %v2097_v56 }
 0x234   :  { %v2098_v57 = vpop.trf.xlu1  ;;  %v2129_v58 = vpop.trf.xlu0 }
 0x235   :  { %3956 = vmatmul.mubr.msk.f32.gmra.mrb[66].mxu1 %vm105_vm0, %v2098_v57 }
 0x236   :  { %3958 = vmatprep.mubr.msk.f32.mxu1 %vm105_vm0, %v2129_v58 }
 0x238   :  { %v2130_v59 = vpop.trf.xlu0  ;;  %v2161_v60 = vpop.trf.xlu1 }
 0x239   :  { %3959 = vmatmul.mubr.msk.f32.gmra.mrb[68].mxu1 %vm105_vm0, %v2130_v59 }
 0x23a   :  { %3961 = vmatprep.mubr.msk.f32.mxu1 %vm105_vm0, %v2161_v60 }
 0x23c   :  { %v2162_v61 = vpop.trf.xlu1  ;;  %v2193_v62 = vpop.trf.xlu0 }
 0x23d   :  { %3962 = vmatmul.mubr.msk.f32.gmra.mrb[70].mxu1 %vm105_vm0, %v2162_v61 }
 0x23e   :  { %3964 = vmatprep.mubr.msk.f32.mxu1 %vm105_vm0, %v2193_v62 }
 0x240   :  { %v2194_v63 = vpop.trf.xlu0  ;;  %v2225_v0 = vpop.trf.xlu1 }
 0x241   :  { %3965 = vmatmul.mubr.msk.f32.gmra.mrb[72].mxu1 %vm105_vm0, %v2194_v63 }
 0x242   :  { %3967 = vmatprep.mubr.msk.f32.mxu1 %vm105_vm0, %v2225_v0 }
 0x244   :  { %v2226_v1 = vpop.trf.xlu1  ;;  %v2257_v2 = vpop.trf.xlu0 }
 0x245   :  { %3968 = vmatmul.mubr.msk.f32.gmra.mrb[74].mxu1 %vm105_vm0, %v2226_v1 }
 0x246   :  { %3970 = vmatprep.mubr.msk.f32.mxu1 %vm105_vm0, %v2257_v2 }
 0x248   :  { %v2258_v3 = vpop.trf.xlu0  ;;  %v2289_v4 = vpop.trf.xlu1 }
 0x249   :  { %3971 = vmatmul.mubr.msk.f32.gmra.mrb[76].mxu1 %vm105_vm0, %v2258_v3 }
 0x24a   :  { %3973 = vmatprep.mubr.msk.f32.mxu1 %vm105_vm0, %v2289_v4 }
 0x24c   :  { %v2290_v5 = vpop.trf.xlu1 }
 0x24d   :  { %3974 = vmatmul.mubr.msk.f32.gmra.mrb[78].mxu1 %vm105_vm0, %v2290_v5 }
 0x284   :  { %v3858_v6 = vpop.f32.mrb[0].mxu1 }
 0x285   :  { %v2613_v7 = vpop.f32.mrb[1].mxu1  ;;  %v4586_v25 = vmul.f32 %v3858_v6, %v3858_v6 }
 0x286   :  { %v4592_v30 = vmul.f32 %v2613_v7, %v2613_v7 }
 0x288   :  { %v3861_v8 = vpop.f32.mrb[2].mxu1 }
 0x289   :  { %v2623_v9 = vpop.f32.mrb[3].mxu1  ;;  %v4606_v28 = vmul.f32 %v3861_v8, %v3861_v8 }
 0x28a   :  { %v4612_v33 = vmul.f32 %v2623_v9, %v2623_v9 }
 0x28c   :  { %v3864_v10 = vpop.f32.mrb[4].mxu1 }
 0x28d   :  { %v2633_v11 = vpop.f32.mrb[5].mxu1  ;;  %v4626_v43 = vmul.f32 %v3864_v10, %v3864_v10 }
 0x28e   :  { %v4632_v47 = vmul.f32 %v2633_v11, %v2633_v11 }
 0x290   :  { %v3867_v12 = vpop.f32.mrb[6].mxu1 }
 0x291   :  { %v2643_v13 = vpop.f32.mrb[7].mxu1  ;;  %v4646_v53 = vmul.f32 %v3867_v12, %v3867_v12 }
 0x292   :  { %v4652_v57 = vmul.f32 %v2643_v13, %v2643_v13 }
 0x294   :  { %v3870_v14 = vpop.f32.mrb[8].mxu1 }
 0x295   :  { %v2653_v15 = vpop.f32.mrb[9].mxu1  ;;  %v4666_v63 = vmul.f32 %v3870_v14, %v3870_v14 }
 0x296   :  { %v4672_v3 = vmul.f32 %v2653_v15, %v2653_v15 }
 0x297   :  { %5151 = vst [vmem:[#allocation21_spill] sm:$0xff] %v4666_v63 }
 0x298   :  { %v3873_v16 = vpop.f32.mrb[10].mxu1  ;;  %5153 = vst [vmem:[#allocation23_spill] sm:$0xff] %v4672_v3 }
 0x299   :  { %v2663_v17 = vpop.f32.mrb[11].mxu1 }
 0x29c   :  { %v4578_v18 = vpop.f32.mrb[12].mxu1 }
 0x29d   :  { %v4580_v19 = vpop.f32.mrb[13].mxu1 }
 0x2a0   :  { %v4582_v20 = vpop.f32.mrb[14].mxu1 }
 0x2a1   :  { %v4584_v21 = vpop.f32.mrb[15].mxu1 }
 0x2a4   :  { %v3882_v24 = vpop.f32.mrb[16].mxu1 }
 0x2a5   :  { %v4588_v22 = vmul.f32 %v3882_v24, %v3882_v24  ;;  %v4590_v26 = vmul.f32 %v3882_v24, %v3858_v6  ;;  %v2693_v23 = vpop.f32.mrb[17].mxu1 }
 0x2a6   :  { %v4594_v31 = vmul.f32 %v2693_v23, %v2693_v23  ;;  %v4596_v32 = vmul.f32 %v2693_v23, %v2613_v7 }
 0x2a7   :  { %5146 = vst [vmem:[#allocation16_spill] sm:$0xff] %v4590_v26  ;;  %v4600_v34 = vadd.f32 %v4588_v22, %v4586_v25 }
 0x2a8   :  { %5147 = vst [vmem:[#allocation17_spill] sm:$0xff] %v4596_v32  ;;  %v4604_v35 = vadd.f32 %v4594_v31, %v4592_v30  ;;  %v3885_v27 = vpop.f32.mrb[18].mxu1 }
 0x2a9   :  { %v4608_v36 = vmul.f32 %v3885_v27, %v3885_v27  ;;  %v4610_v37 = vmul.f32 %v3885_v27, %v3861_v8  ;;  %v2703_v29 = vpop.f32.mrb[19].mxu1 }
 0x2aa   :  { %v4614_v38 = vmul.f32 %v2703_v29, %v2703_v29  ;;  %v4616_v39 = vmul.f32 %v2703_v29, %v2623_v9  ;;  %v4686_v9 = vmul.f32 %v3873_v16, %v3873_v16 }
 0x2ab   :  { %5148 = vst [vmem:[#allocation18_spill] sm:$0xff] %v4610_v37  ;;  %v4620_v40 = vadd.f32 %v4608_v36, %v4606_v28 }
 0x2ac   :  { %v4624_v41 = vadd.f32 %v4614_v38, %v4612_v33  ;;  %v3888_v42 = vpop.f32.mrb[20].mxu1  ;;  %5155 = vst [vmem:[#allocation25_spill] sm:$0xff] %v4686_v9 }
 0x2ad   :  { %v4628_v44 = vmul.f32 %v3888_v42, %v3888_v42  ;;  %v4630_v45 = vmul.f32 %v3888_v42, %v3864_v10  ;;  %v2713_v46 = vpop.f32.mrb[21].mxu1 }
 0x2ae   :  { %v4634_v48 = vmul.f32 %v2713_v46, %v2713_v46  ;;  %v4636_v49 = vmul.f32 %v2713_v46, %v2633_v11  ;;  %v4717_v46 = vmul.f32 %v4580_v19, %v4580_v19 }
 0x2af   :  { %5149 = vst [vmem:[#allocation19_spill] sm:$0xff] %v4630_v45  ;;  %v4640_v50 = vadd.f32 %v4628_v44, %v4626_v43 }
 0x2b0   :  { %v4644_v51 = vadd.f32 %v4634_v48, %v4632_v47  ;;  %v3891_v52 = vpop.f32.mrb[22].mxu1  ;;  %5162 = vst [vmem:[#allocation32_spill] sm:$0xff] %v4717_v46 }
 0x2b1   :  { %v4648_v54 = vmul.f32 %v3891_v52, %v3891_v52  ;;  %v4650_v55 = vmul.f32 %v3891_v52, %v3867_v12  ;;  %v2723_v56 = vpop.f32.mrb[23].mxu1 }
 0x2b2   :  { %v4654_v58 = vmul.f32 %v2723_v56, %v2723_v56  ;;  %v4656_v59 = vmul.f32 %v2723_v56, %v2643_v13  ;;  %v4692_v13 = vmul.f32 %v2663_v17, %v2663_v17 }
 0x2b3   :  { %5150 = vst [vmem:[#allocation20_spill] sm:$0xff] %v4650_v55  ;;  %v4660_v60 = vadd.f32 %v4648_v54, %v4646_v53 }
 0x2b4   :  { %v4664_v61 = vadd.f32 %v4654_v58, %v4652_v57  ;;  %v3894_v62 = vpop.f32.mrb[24].mxu1  ;;  %5157 = vst [vmem:[#allocation27_spill] sm:$0xff] %v4692_v13 }
 0x2b5   :  { %v4668_v0 = vmul.f32 %v3894_v62, %v3894_v62  ;;  %v4670_v1 = vmul.f32 %v3894_v62, %v3870_v14  ;;  %v2733_v2 = vpop.f32.mrb[25].mxu1 }
 0x2b6   :  { %v4674_v4 = vmul.f32 %v2733_v2, %v2733_v2  ;;  %v4676_v5 = vmul.f32 %v2733_v2, %v2653_v15 }
 0x2b7   :  { %5152 = vst [vmem:[#allocation22_spill] sm:$0xff] %v4668_v0  ;;  %v4680_v6 = vadd.f32 %v4668_v0, %v4666_v63 }
 0x2b8   :  { %5154 = vst [vmem:[#allocation24_spill] sm:$0xff] %v4674_v4  ;;  %v4684_v7 = vadd.f32 %v4674_v4, %v4672_v3  ;;  %v3897_v8 = vpop.f32.mrb[26].mxu1  ;;  %v3109_v3 = vmul.f32 2.0, %v4590_v26 }
 0x2b9   :  { %v4688_v10 = vmul.f32 %v3897_v8, %v3897_v8  ;;  %v4690_v11 = vmul.f32 %v3897_v8, %v3873_v16  ;;  %v2743_v12 = vpop.f32.mrb[27].mxu1  ;;  %v4708_v16 = vmul.f32 %v4578_v18, %v4578_v18  ;;  %v4734_v8 = vmul.f32 %v4582_v20, %v4582_v20 }
 0x2ba   :  { %v4694_v14 = vmul.f32 %v2743_v12, %v2743_v12  ;;  %v4696_v15 = vmul.f32 %v2743_v12, %v2663_v17 }
 0x2bb   :  { %5156 = vst [vmem:[#allocation26_spill] sm:$0xff] %v4688_v10  ;;  %v4700_v24 = vadd.f32 %v4688_v10, %v4686_v9  ;;  %5160 = vst [vmem:[#allocation30_spill] sm:$0xff] %v4708_v16  ;;  %v3112_v9 = vmul.f32 2.0, %v4636_v49 }
 0x2bc   :  { %5158 = vst [vmem:[#allocation28_spill] sm:$0xff] %v4694_v14  ;;  %v4704_v23 = vadd.f32 %v4694_v14, %v4692_v13  ;;  %v3900_v27 = vpop.f32.mrb[28].mxu1  ;;  %5166 = vst [vmem:[#allocation36_spill] sm:$0xff] %v4734_v8  ;;  %v3111_v13 = vmul.f32 2.0, %v4610_v37  ;;  %v3204_v37 = vadd.f32 0.0001, %v4604_v35 }
 0x2bd   :  { %v4710_v29 = vmul.f32 %v3900_v27, %v3900_v27  ;;  %v4713_v42 = vmul.f32 %v3900_v27, %v4578_v18  ;;  %v2753_v17 = vpop.f32.mrb[29].mxu1 }
 0x2be   :  { %5159 = vst [vmem:[#allocation29_spill] sm:$0xff] %v4704_v23  ;;  %v4719_v52 = vmul.f32 %v2753_v17, %v2753_v17  ;;  %v4722_v56 = vmul.f32 %v2753_v17, %v4580_v19  ;;  %v4743_v17 = vmul.f32 %v4584_v21, %v4584_v21 }
 0x2bf   :  { %5161 = vst [vmem:[#allocation31_spill] sm:$0xff] %v4710_v29  ;;  %v4726_v62 = vadd.f32 %v4710_v29, %v4708_v16  ;;  %v3110_v16 = vmul.f32 2.0, %v4616_v39 }
 0x2c0   :  { %5163 = vst [vmem:[#allocation33_spill] sm:$0xff] %v4719_v52  ;;  %v4730_v2 = vadd.f32 %v4719_v52, %v4717_v46  ;;  %v3903_v18 = vpop.f32.mrb[30].mxu1  ;;  %v3205_v46 = vadd.f32 0.0001, %v4600_v34  ;;  %v3115_v34 = vmul.f32 2.0, %v4650_v55 }
 0x2c1   :  { %5164 = vst [vmem:[#allocation34_spill] sm:$0xff] %v4726_v62  ;;  %v4736_v12 = vmul.f32 %v3903_v18, %v3903_v18  ;;  %v4739_v27 = vmul.f32 %v3903_v18, %v4582_v20  ;;  %v2763_v19 = vpop.f32.mrb[31].mxu1 }
 0x2c2   :  { %5165 = vst [vmem:[#allocation35_spill] sm:$0xff] %v4730_v2  ;;  %v4745_v29 = vmul.f32 %v2763_v19, %v2763_v19  ;;  %v4748_v52 = vmul.f32 %v2763_v19, %v4584_v21 }
 0x2c3   :  { %5167 = vst [vmem:[#allocation37_spill] sm:$0xff] %v4736_v12  ;;  %5168 = vst [vmem:[#allocation38_spill] sm:$0xff] %v4739_v27  ;;  %v4752_v14 = vadd.f32 %v4736_v12, %v4734_v8 }
 0x2c4   :  { %5169 = vst [vmem:[#allocation39_spill] sm:$0xff] %v4745_v29  ;;  %5170 = vst [vmem:[#allocation40_spill] sm:$0xff] %v4748_v52  ;;  %v4756_v10 = vadd.f32 %v4745_v29, %v4743_v17  ;;  %v3906_v20 = vpop.f32.mrb[32].mxu1  ;;  %v3207_v29 = vadd.f32 0.0001, %v4620_v40 }
 0x2c5   :  { %5171 = vst [vmem:[#allocation41_spill] sm:$0xff] %v4752_v14  ;;  %v3061_v18 = vsub.f32 %v3906_v20, %v4586_v25  ;;  %v2773_v2 = vpop.f32.mrb[33].mxu1  ;;  %v3113_v25 = vmul.f32 2.0, %v4630_v45  ;;  %v3206_v45 = vadd.f32 0.0001, %v4624_v41  ;;  %v3117_v41 = vmul.f32 2.0, %v4670_v1 }
 0x2c6   :  { %5172 = vst [vmem:[#allocation42_spill] sm:$0xff] %v4756_v10  ;;  %v3060_v27 = vsub.f32 %v2773_v2, %v4592_v30  ;;  %v3108_v2 = vmul.f32 2.0, %v4596_v32 }
 0x2c8   :  { %v4760_v62 = vpop.f32.mrb[34].mxu1  ;;  %v4824_v32 = vadd.f32 0.0001, %v3108_v2 }
 0x2c9   :  { %v4764_v19 = vpop.f32.mrb[35].mxu1 }
 0x2ca   :  { %5178 = vst [vmem:[#allocation48_spill] sm:$0xff] %v4824_v32  ;;  %v4837_v32 = vadd.f32 0.0001, %v3113_v25 }
 0x2cc   :  { %v4768_v14 = vpop.f32.mrb[36].mxu1 }
 0x2cd   :  { %v4772_v10 = vpop.f32.mrb[37].mxu1 }
 0x2d0   :  { %v4776_v30 = vpop.f32.mrb[38].mxu1 }
 0x2d1   :  { %v4780_v20 = vpop.f32.mrb[39].mxu1 }
 0x2d4   :  { %v4784_v21 = vpop.f32.mrb[40].mxu1 }
 0x2d5   :  { %v4788_v52 = vpop.f32.mrb[41].mxu1 }
 0x2d6   :  { %5173 = vst [vmem:[#allocation43_spill] sm:$0xff] %v4788_v52 }
 0x2d8   :  { %v4792_v4 = vpop.f32.mrb[42].mxu1 }
 0x2d9   :  { %v4796_v0 = vpop.f32.mrb[43].mxu1 }
 0x2dc   :  { %v4800_v23 = vpop.f32.mrb[44].mxu1 }
 0x2dd   :  { %5174 = vst [vmem:[#allocation44_spill] sm:$0xff] %v4800_v23  ;;  %v4804_v63 = vpop.f32.mrb[45].mxu1  ;;  %v4820_v23 = vadd.f32 0.0001, %v3109_v3 }
 0x2de   :  { %5175 = vst [vmem:[#allocation45_spill] sm:$0xff] %v4804_v63  ;;  %v4829_v63 = vadd.f32 0.0001, %v3111_v13 }
 0x2df   :  { %5177 = vst [vmem:[#allocation47_spill] sm:$0xff] %v4820_v23  ;;  %v4833_v23 = vadd.f32 0.0001, %v3110_v16 }
 0x2e0   :  { %v4809_v52 = vpop.f32.mrb[46].mxu1  ;;  %5179 = vst [vmem:[#allocation49_spill] sm:$0xff] %v4829_v63  ;;  %v4841_v63 = vadd.f32 0.0001, %v3112_v9  ;;  %v5180_v9 = vsub.f32 %v4760_v62, %v4606_v28  ;;  %v4863_v28 = vadd.f32 0.0001, %v3117_v41 }
 0x2e1   :  { %5176 = vst [vmem:[#allocation46_spill] sm:$0xff] %v4809_v52  ;;  %v4814_v12 = vpop.f32.mrb[47].mxu1 }
 0x2e4   :  { %v3930_v26 = vpop.f32.mrb[48].mxu1 }
 0x2e5   :  { %v3077_v8 = vsub.f32 %v3930_v26, %v4588_v22  ;;  %v2853_v52 = vpop.f32.mrb[49].mxu1  ;;  %v3209_v22 = vadd.f32 0.0001, %v4640_v50  ;;  %v3114_v26 = vmul.f32 2.0, %v4656_v59  ;;  %v3211_v50 = vadd.f32 0.0001, %v4660_v60 }
 0x2e6   :  { %v3076_v3 = vsub.f32 %v2853_v52, %v4594_v31  ;;  %v3208_v52 = vadd.f32 0.0001, %v4644_v51  ;;  %v5181_v51 = vsub.f32 %v4764_v19, %v4612_v33  ;;  %v3119_v33 = vmul.f32 2.0, %v4690_v11 }
 0x2e7   :  { %v3221_v2 = vadd.f32 %v3077_v8, %v3061_v18  ;;  %v4847_v18 = vadd.f32 0.0001, %v3115_v34  ;;  %v3210_v34 = vadd.f32 0.0001, %v4664_v61  ;;  %v5182_v61 = vsub.f32 %v4768_v14, %v4626_v43 }
 0x2e8   :  { %v3220_v35 = vadd.f32 %v3076_v3, %v3060_v27  ;;  %v3933_v13 = vpop.f32.mrb[50].mxu1  ;;  %v4853_v3 = vadd.f32 0.0001, %v3114_v26  ;;  %v3121_v43 = vmul.f32 2.0, %v4713_v42 }
 0x2e9   :  { %v3237_v40 = vadd.f32 0.0009, %v3221_v2  ;;  %v3079_v31 = vsub.f32 %v3933_v13, %v4608_v36  ;;  %v2863_v16 = vpop.f32.mrb[51].mxu1  ;;  %v3116_v36 = vmul.f32 2.0, %v4676_v5 }
 0x2ea   :  { %v3236_v55 = vadd.f32 0.0009, %v3220_v35  ;;  %v3078_v8 = vsub.f32 %v2863_v16, %v4614_v38  ;;  %v5183_v16 = vsub.f32 %v4772_v10, %v4632_v47 }
 0x2eb   :  { %v3253_v25 = vmul.f32 %v3237_v40, %v3205_v46  ;;  %v3223_v27 = vadd.f32 %v3079_v31, %v5180_v9  ;;  %v4872_v40 = vadd.f32 0.0001, %v3116_v36  ;;  %v4882_v36 = vadd.f32 0.0001, %v3119_v33 }
 0x2ec   :  { %v4856_v2 = vmul.f32 %v3236_v55, %v3204_v37  ;;  %v3222_v35 = vadd.f32 %v3078_v8, %v5181_v51  ;;  %v3936_v38 = vpop.f32.mrb[52].mxu1  ;;  %v3213_v55 = vadd.f32 0.0001, %v4680_v6 }
 0x2ed   :  { %3992 = vrcp.f32 %v3253_v25  ;;  %v3239_v60 = vadd.f32 0.0009, %v3223_v27  ;;  %v3081_v46 = vsub.f32 %v3936_v38, %v4628_v44  ;;  %v2873_v13 = vpop.f32.mrb[53].mxu1  ;;  %v3118_v44 = vmul.f32 2.0, %v4696_v15 }
 0x2ee   :  { %3994 = vrcp.f32 %v4856_v2  ;;  %v3238_v62 = vadd.f32 0.0009, %v3222_v35  ;;  %v3080_v37 = vsub.f32 %v2873_v13, %v4634_v48  ;;  %v3212_v48 = vadd.f32 0.0001, %v4684_v7 }
 0x2ef   :  { %v3255_v19 = vmul.f32 %v3239_v60, %v3207_v29  ;;  %v3225_v26 = vadd.f32 %v3081_v46, %v5182_v61  ;;  %v5184_v7 = vsub.f32 %v4776_v30, %v4646_v53  ;;  %v4890_v51 = vadd.f32 0.0001, %v3118_v44  ;;  %v5186_v46 = vld [vmem:[#allocation29_spill] sm:$0xff] }
 0x2f0   :  { %v3254_v31 = vmul.f32 %v3238_v62, %v3206_v45  ;;  %v3224_v41 = vadd.f32 %v3080_v37, %v5183_v16  ;;  %v3939_v8 = vpop.f32.mrb[54].mxu1  ;;  %v3215_v45 = vadd.f32 0.0001, %v4700_v24  ;;  %v5185_v38 = vsub.f32 %v4780_v20, %v4652_v57  ;;  %v5191_v20 = vld [vmem:[#allocation38_spill] sm:$0xff] }
 0x2f1   :  { %3996 = vrcp.f32 %v3255_v19  ;;  %v3241_v6 = vadd.f32 0.0009, %v3225_v26  ;;  %v3083_v29 = vsub.f32 %v3939_v8, %v4648_v54  ;;  %v2883_v9 = vpop.f32.mrb[55].mxu1  ;;  %v3120_v54 = vmul.f32 2.0, %v4722_v56  ;;  %v5190_v26 = vld [vmem:[#allocation34_spill] sm:$0xff] }
 0x2f2   :  { %3998 = vrcp.f32 %v3254_v31  ;;  %v3240_v14 = vadd.f32 0.0009, %v3224_v41  ;;  %v3082_v27 = vsub.f32 %v2883_v9, %v4654_v58  ;;  %v3214_v13 = vadd.f32 0.0001, %v5186_v46  ;;  %v5192_v41 = vld [vmem:[#allocation21_spill] sm:$0xff] }
 0x2f3   :  { %v4885_v47 = vmul.f32 %v3241_v6, %v3209_v22  ;;  %v3227_v10 = vadd.f32 %v3083_v29, %v5184_v7  ;;  %v5187_v22 = vld [vmem:[#allocation22_spill] sm:$0xff]  ;;  %v4901_v30 = vadd.f32 0.0001, %v3121_v43  ;;  %v3217_v57 = vadd.f32 0.0001, %v5190_v26  ;;  %v5196_v7 = vld [vmem:[#allocation23_spill] sm:$0xff] }
 0x2f4   :  { %v4893_v35 = vmul.f32 %v3240_v14, %v3208_v52  ;;  %v3226_v58 = vadd.f32 %v3082_v27, %v5185_v38  ;;  %v3942_v60 = vpop.f32.mrb[56].mxu1  ;;  %v5189_v52 = vld [vmem:[#allocation24_spill] sm:$0xff]  ;;  %v3123_v44 = vmul.f32 2.0, %v5191_v20  ;;  %v5193_v8 = vsub.f32 %v4784_v21, %v5192_v41  ;;  %v5195_v27 = vld [vmem:[#allocation43_spill] sm:$0xff]  ;;  %v5204_v41 = vld [vmem:[#allocation25_spill] sm:$0xff] }
 0x2f5   :  { %4000 = vrcp.f32 %v4885_v47  ;;  %v3243_v24 = vadd.f32 0.0009, %v3227_v10  ;;  %v3085_v62 = vsub.f32 %v3942_v60, %v5187_v22  ;;  %v2893_v53 = vpop.f32.mrb[57].mxu1  ;;  %5188 = vst [vmem:[#allocation29_spill] sm:$0xff] %v4901_v30  ;;  %v4912_v9 = vadd.f32 0.0001, %v3120_v54 }
 0x2f6   :  { %4002 = vrcp.f32 %v4893_v35  ;;  %v3242_v37 = vadd.f32 0.0009, %v3226_v58  ;;  %v3084_v33 = vsub.f32 %v2893_v53, %v5189_v52  ;;  %v5197_v10 = vsub.f32 %v5195_v27, %v5196_v7  ;;  %v5198_v60 = vld [vmem:[#allocation35_spill] sm:$0xff]  ;;  %v5202_v52 = vld [vmem:[#allocation40_spill] sm:$0xff] }
 0x2f7   :  { %v3993_v61 = vpop.eup %3992  ;;  %v4907_v16 = vmul.f32 %v3243_v24, %v3211_v50  ;;  %v3229_v6 = vadd.f32 %v3085_v62, %v5193_v8  ;;  %5194 = vst [vmem:[#allocation22_spill] sm:$0xff] %v4912_v9  ;;  %v3216_v46 = vadd.f32 0.0001, %v5198_v60  ;;  %v5199_v24 = vld [vmem:[#allocation26_spill] sm:$0xff]  ;;  %v5205_v8 = vsub.f32 %v4792_v4, %v5204_v41  ;;  %v5216_v9 = vld [vmem:[#allocation32_spill] sm:$0xff] }
 0x2f8   :  { %v3995_v29 = vpop.eup %3994  ;;  %v3285_v43 = vmul.f32 %v3993_v61, %v3253_v25  ;;  %v4914_v14 = vmul.f32 %v3242_v37, %v3210_v34  ;;  %v3228_v38 = vadd.f32 %v3084_v33, %v5197_v10  ;;  %v3945_v58 = vpop.f32.mrb[58].mxu1  ;;  %v5200_v34 = vld [vmem:[#allocation28_spill] sm:$0xff]  ;;  %v4925_v37 = vadd.f32 0.0001, %v3123_v44 }
 0x2f9   :  { %4004 = vrcp.f32 %v4907_v16  ;;  %v3245_v50 = vadd.f32 0.0009, %v3229_v6  ;;  %v3087_v22 = vsub.f32 %v3945_v58, %v5199_v24  ;;  %v2903_v21 = vpop.f32.mrb[59].mxu1  ;;  %v3284_v62 = vmul.f32 %v3995_v29, %v4856_v2 }
 0x2fa   :  { %4006 = vrcp.f32 %v4914_v14  ;;  %v3244_v25 = vadd.f32 0.0009, %v3228_v38  ;;  %v3086_v54 = vsub.f32 %v2903_v21, %v5200_v34  ;;  %5201 = vst [vmem:[#allocation24_spill] sm:$0xff] %v4925_v37  ;;  %v4928_v33 = vmul.f32 2.0, %v5202_v52  ;;  %v5206_v38 = vld [vmem:[#allocation27_spill] sm:$0xff]  ;;  %v5210_v34 = vld [vmem:[#allocation41_spill] sm:$0xff] }
 0x2fb   :  { %v3997_v53 = vpop.eup %3996  ;;  %v4930_v26 = vmul.f32 %v3245_v50, %v3213_v55  ;;  %v3231_v6 = vadd.f32 %v3087_v22, %v5205_v8  ;;  %v3301_v2 = vsub.f32 2.0, %v3285_v43  ;;  %v5207_v58 = vsub.f32 %v4796_v0, %v5206_v38  ;;  %v5208_v50 = vld [vmem:[#allocation31_spill] sm:$0xff]  ;;  %v5211_v0 = vld [vmem:[#allocation42_spill] sm:$0xff] }
 0x2fc   :  { %5203 = vst [vmem:[#allocation34_spill] sm:$0xff] %v4928_v33  ;;  %v4935_v27 = vpop.eup %3998  ;;  %v3287_v7 = vmul.f32 %v3997_v53, %v3255_v19  ;;  %v4937_v10 = vmul.f32 %v3244_v25, %v3212_v48  ;;  %v3948_v60 = vpop.f32.mrb[60].mxu1  ;;  %v3300_v22 = vsub.f32 2.0, %v3284_v62  ;;  %v5209_v19 = vld [vmem:[#allocation33_spill] sm:$0xff]  ;;  %v3219_v41 = vadd.f32 0.0001, %v5210_v34 }
 0x2fd   :  { %v3230_v44 = vadd.f32 %v3086_v54, %v5207_v58  ;;  %v3286_v24 = vmul.f32 %v4935_v27, %v3254_v31  ;;  %4008 = vrcp.f32 %v4930_v26  ;;  %v3247_v55 = vadd.f32 0.0009, %v3231_v6  ;;  %v2913_v4 = vpop.f32.mrb[61].mxu1  ;;  %v5212_v31 = vld [vmem:[#allocation44_spill] sm:$0xff]  ;;  %v5213_v38 = vld [vmem:[#allocation30_spill] sm:$0xff]  ;;  %v5215_v62 = vld [vmem:[#allocation45_spill] sm:$0xff] }
 0x2fe   :  { %v3089_v21 = vsub.f32 %v3948_v60, %v5208_v50  ;;  %4010 = vrcp.f32 %v4937_v10  ;;  %v3088_v48 = vsub.f32 %v2913_v4, %v5209_v19  ;;  %v3218_v54 = vadd.f32 0.0001, %v5211_v0 }
 0x2ff   :  { %v3246_v43 = vadd.f32 0.0009, %v3230_v44  ;;  %v4001_v25 = vpop.eup %4000  ;;  %v4949_v8 = vmul.f32 %v3247_v55, %v3215_v45  ;;  %v5214_v58 = vsub.f32 %v5212_v31, %v5213_v38  ;;  %v3303_v60 = vsub.f32 2.0, %v3287_v7  ;;  %v5218_v45 = vld [vmem:[#allocation37_spill] sm:$0xff]  ;;  %v5219_v31 = vld [vmem:[#allocation39_spill] sm:$0xff] }
 0x300   :  { %v4003_v37 = vpop.eup %4002  ;;  %v5217_v44 = vsub.f32 %v5215_v62, %v5216_v9  ;;  %v3951_v4 = vpop.f32.mrb[62].mxu1  ;;  %v3317_v19 = vmul.f32 %v3993_v61, %v3301_v2  ;;  %v3302_v30 = vsub.f32 2.0, %v3286_v24  ;;  %v3289_v34 = vmul.f32 %v4001_v25, %v4885_v47  ;;  %v5220_v61 = vld [vmem:[#allocation46_spill] sm:$0xff]  ;;  %v5221_v2 = vld [vmem:[#allocation36_spill] sm:$0xff] }
 0x301   :  { %v3233_v6 = vadd.f32 %v3089_v21, %v5214_v58  ;;  %v4954_v50 = vmul.f32 %v3246_v43, %v3214_v13  ;;  %v3091_v55 = vsub.f32 %v3951_v4, %v5218_v45  ;;  %v2923_v52 = vpop.f32.mrb[63].mxu1  ;;  %4012 = vrcp.f32 %v4949_v8  ;;  %v5224_v62 = vld [vmem:[#allocation16_spill] sm:$0xff] }
 0x302   :  { %v3232_v33 = vadd.f32 %v3088_v48, %v5217_v44  ;;  %v3090_v7 = vsub.f32 %v2923_v52, %v5219_v31  ;;  %v3316_v13 = vmul.f32 %v3995_v29, %v3300_v22  ;;  %v3288_v38 = vmul.f32 %v4003_v37, %v4893_v35 }
 0x303   :  { %v3249_v0 = vadd.f32 0.0009, %v3233_v6  ;;  %v4005_v43 = vpop.eup %4004  ;;  %4014 = vrcp.f32 %v4954_v50  ;;  %v5222_v47 = vsub.f32 %v5220_v61, %v5221_v2  ;;  %v5223_v52 = vsub.f32 %v4814_v12, %v4743_v17 }
 0x304   :  { %v3248_v21 = vadd.f32 0.0009, %v3232_v33  ;;  %v4007_v48 = vpop.eup %4006  ;;  %v3291_v58 = vmul.f32 %v4005_v43, %v4907_v16  ;;  %v3954_v33 = vpop.f32.mrb[64].mxu1  ;;  %v4976_v22 = vmul.f32 %v3997_v53, %v3303_v60  ;;  %v3305_v35 = vsub.f32 2.0, %v3289_v34 }
 0x305   :  { %v4965_v9 = vmul.f32 %v3249_v0, %v3217_v57  ;;  %v3235_v24 = vadd.f32 %v3091_v55, %v5222_v47  ;;  %v3234_v29 = vadd.f32 %v3090_v7, %v5223_v52  ;;  %v3093_v44 = vsub.f32 %v3954_v33, %v5224_v62  ;;  %v2933_v4 = vpop.f32.mrb[65].mxu1 }
 0x306   :  { %v4971_v6 = vmul.f32 %v3248_v21, %v3216_v46  ;;  %v3290_v0 = vmul.f32 %v4007_v48, %v4914_v14  ;;  %v5225_v46 = vld [vmem:[#allocation17_spill] sm:$0xff]  ;;  %v3304_v12 = vsub.f32 2.0, %v3288_v38  ;;  %v3307_v17 = vsub.f32 2.0, %v3291_v58  ;;  %v5226_v38 = vld [vmem:[#allocation18_spill] sm:$0xff] }
 0x307   :  { %4016 = vrcp.f32 %v4965_v9  ;;  %v3251_v57 = vadd.f32 0.0009, %v3235_v24  ;;  %v3250_v16 = vadd.f32 0.0009, %v3234_v29  ;;  %v3092_v45 = vsub.f32 %v2933_v4, %v5225_v46  ;;  %v4009_v55 = vpop.eup %4008 }
 0x308   :  { %4018 = vrcp.f32 %v4971_v6  ;;  %v3141_v53 = vmul.f32 2.0, %v3093_v44  ;;  %v4985_v60 = vpop.eup %4010  ;;  %v3293_v34 = vmul.f32 %v4009_v55, %v4930_v26  ;;  %v3957_v61 = vpop.f32.mrb[66].mxu1  ;;  %v3318_v14 = vmul.f32 %v4935_v27, %v3302_v30  ;;  %v5228_v44 = vld [vmem:[#allocation48_spill] sm:$0xff] }
 0x309   :  { %v4983_v21 = vmul.f32 %v3251_v57, %v3219_v41  ;;  %v4988_v31 = vmul.f32 %v3250_v16, %v3218_v54  ;;  %v3140_v7 = vmul.f32 2.0, %v3092_v45  ;;  %v4993_v2 = vmul.f32 %v4985_v60, %v4937_v10  ;;  %v2943_v41 = vpop.f32.mrb[67].mxu1  ;;  %v5227_v54 = vld [vmem:[#allocation47_spill] sm:$0xff] }
 0x30a   :  { %v3157_v47 = vadd.f32 0.0009, %v3141_v53  ;;  %v3095_v24 = vsub.f32 %v3957_v61, %v5226_v38  ;;  %v3321_v58 = vmul.f32 %v4001_v25, %v3305_v35  ;;  %v3306_v52 = vsub.f32 2.0, %v3290_v0  ;;  %v5229_v45 = vld [vmem:[#allocation19_spill] sm:$0xff]  ;;  %v5230_v38 = vld [vmem:[#allocation49_spill] sm:$0xff] }
 0x30b   :  { %4020 = vrcp.f32 %v4983_v21  ;;  %v3156_v29 = vadd.f32 0.0009, %v3140_v7  ;;  %v3094_v26 = vsub.f32 %v2943_v41, %v4616_v39  ;;  %v3320_v62 = vmul.f32 %v4003_v37, %v3304_v12  ;;  %v5001_v27 = vpop.eup %4012 }
 0x30c   :  { %v3173_v33 = vmul.f32 %v3157_v47, %v5227_v54  ;;  %v3143_v57 = vmul.f32 2.0, %v3095_v24  ;;  %v4999_v30 = vmul.f32 %v4005_v43, %v3307_v17  ;;  %v3309_v10 = vsub.f32 2.0, %v3293_v34  ;;  %v3960_v35 = vpop.f32.mrb[68].mxu1 }
 0x30d   :  { %4022 = vrcp.f32 %v4988_v31  ;;  %v3172_v4 = vmul.f32 %v3156_v29, %v5228_v44  ;;  %v3142_v25 = vmul.f32 2.0, %v3094_v26  ;;  %v5005_v0 = vpop.eup %4014  ;;  %v3308_v16 = vsub.f32 2.0, %v4993_v2  ;;  %v2953_v37 = vpop.f32.mrb[69].mxu1 }
 0x30e   :  { %v3333_v39 = vmul.f32 %v3317_v19, %v3173_v33  ;;  %v3159_v46 = vadd.f32 0.0009, %v3143_v57  ;;  %v3097_v53 = vsub.f32 %v3960_v35, %v5229_v45  ;;  %v3096_v17 = vsub.f32 %v2953_v37, %v4636_v49 }
 0x30f   :  { %v3332_v43 = vmul.f32 %v3316_v13, %v3172_v4  ;;  %v3158_v12 = vadd.f32 0.0009, %v3142_v25  ;;  %v3322_v34 = vmul.f32 %v4007_v48, %v3306_v52  ;;  %v5014_v61 = vmul.f32 %v5001_v27, %v4949_v8  ;;  %v5231_v25 = vld [vmem:[#allocation20_spill] sm:$0xff] }
 0x310   :  { %v3349_v47 = vsel %vm105_vm0, %v3333_v39, 0.0  ;;  %v3175_v24 = vmul.f32 %v3159_v46, %v5230_v38  ;;  %v3145_v19 = vmul.f32 2.0, %v3097_v53  ;;  %v5022_v13 = vmul.f32 %v5005_v0, %v4954_v50  ;;  %v3963_v29 = vpop.f32.mrb[70].mxu1 }
 0x311   :  { %v5010_v7 = vpop.eup %4016  ;;  %v3348_v49 = vsel %vm105_vm0, %v3332_v43, 0.0  ;;  %v3174_v48 = vmul.f32 %v3158_v12, %v4833_v23  ;;  %v3144_v52 = vmul.f32 2.0, %v3096_v17  ;;  %v2963_v57 = vpop.f32.mrb[71].mxu1  ;;  %v3099_v50 = vsub.f32 %v3963_v29, %v5231_v25 }
 0x312   :  { %v5018_v41 = vpop.eup %4018  ;;  %v5028_v8 = vmul.f32 %v5010_v7, %v4965_v9  ;;  %v3350_v26 = vadd.f32 %v3349_v47, %v3348_v49  ;;  %v3335_v54 = vmul.f32 %v4976_v22, %v3175_v24  ;;  %v3161_v33 = vadd.f32 0.0009, %v3145_v19 }
 0x313   :  { %v3334_v44 = vmul.f32 %v3318_v14, %v3174_v48  ;;  %v3160_v4 = vadd.f32 0.0009, %v3144_v52  ;;  %v3325_v35 = vmul.f32 %v4009_v55, %v3309_v10  ;;  %v3311_v39 = vsub.f32 2.0, %v5014_v61 }
 0x314   :  { %v5035_v23 = vmul.f32 %v5018_v41, %v4971_v6  ;;  %v3177_v46 = vmul.f32 %v3161_v33, %v4837_v32  ;;  %v3098_v9 = vsub.f32 %v2963_v57, %v4656_v59  ;;  %v3310_v22 = vsub.f32 2.0, %v5022_v13  ;;  %v3966_v55 = vpop.f32.mrb[72].mxu1 }
 0x315   :  { %v5039_v45 = vpop.eup %4020  ;;  %v3351_v14 = vsel %vm105_vm0, %v3334_v44, 0.0  ;;  %v3176_v53 = vmul.f32 %v3160_v4, %v4841_v63  ;;  %v3147_v37 = vmul.f32 2.0, %v3099_v50  ;;  %v3313_v10 = vsub.f32 2.0, %v5028_v8  ;;  %v2973_v17 = vpop.f32.mrb[73].mxu1 }
 0x316   :  { %v3352_v43 = vadd.f32 %v3351_v14, %v3350_v26  ;;  %v3337_v12 = vmul.f32 %v3321_v58, %v3177_v46  ;;  %v3146_v6 = vmul.f32 2.0, %v3098_v9  ;;  %v3353_v32 = vsel %vm105_vm0, %v3335_v54, 0.0 }
 0x317   :  { %v5045_v61 = vpop.eup %4022  ;;  %v3336_v59 = vmul.f32 %v3320_v62, %v3176_v53  ;;  %v3163_v47 = vadd.f32 0.0009, %v3147_v37  ;;  %v3101_v38 = vsub.f32 %v3966_v55, %v4670_v1  ;;  %v3312_v24 = vsub.f32 2.0, %v5035_v23 }
 0x318   :  { %v5052_v63 = vmul.f32 %v5039_v45, %v4983_v21  ;;  %v3354_v19 = vadd.f32 %v3353_v32, %v3352_v43  ;;  %v3162_v13 = vadd.f32 0.0009, %v3146_v6  ;;  %v3100_v52 = vsub.f32 %v2973_v17, %v4676_v5  ;;  %v3969_v29 = vpop.f32.mrb[74].mxu1 }
 0x319   :  { %v3355_v58 = vsel %vm105_vm0, %v3336_v59, 0.0  ;;  %v3179_v49 = vmul.f32 %v3163_v47, %v4847_v18  ;;  %v3149_v48 = vmul.f32 2.0, %v3101_v38  ;;  %v5059_v62 = vmul.f32 %v5045_v61, %v4988_v31  ;;  %v2983_v54 = vpop.f32.mrb[75].mxu1 }
 0x31a   :  { %v3356_v1 = vadd.f32 %v3355_v58, %v3354_v19  ;;  %v3178_v26 = vmul.f32 %v3162_v13, %v4853_v3  ;;  %v3103_v21 = vsub.f32 %v3969_v29, %v4690_v11  ;;  %v3357_v33 = vsel %vm105_vm0, %v3337_v12, 0.0 }
 0x31b   :  { %v3339_v57 = vmul.f32 %v4999_v30, %v3179_v49  ;;  %v3165_v44 = vadd.f32 0.0009, %v3149_v48  ;;  %v3148_v18 = vmul.f32 2.0, %v3100_v52  ;;  %v3102_v50 = vsub.f32 %v2983_v54, %v4696_v15  ;;  %v5233_v49 = vld [vmem:[#allocation29_spill] sm:$0xff]  ;;  %v5235_v54 = vld [vmem:[#allocation22_spill] sm:$0xff] }
 0x31c   :  { %v3338_v4 = vmul.f32 %v3322_v34, %v3178_v26  ;;  %v3358_v25 = vadd.f32 %v3357_v33, %v3356_v1  ;;  %v3151_v5 = vmul.f32 2.0, %v3103_v21  ;;  %v3324_v3 = vmul.f32 %v4985_v60, %v3308_v16  ;;  %v3972_v9 = vpop.f32.mrb[76].mxu1 }
 0x31d   :  { %v3181_v31 = vmul.f32 %v3165_v44, %v4863_v28  ;;  %v3164_v46 = vadd.f32 0.0009, %v3148_v18  ;;  %v3327_v11 = vmul.f32 %v5001_v27, %v3311_v39  ;;  %v3150_v53 = vmul.f32 2.0, %v3102_v50  ;;  %v2993_v37 = vpop.f32.mrb[77].mxu1 }
 0x31e   :  { %v3359_v14 = vsel %vm105_vm0, %v3338_v4, 0.0  ;;  %v3167_v30 = vadd.f32 0.0009, %v3151_v5  ;;  %v3105_v34 = vsub.f32 %v3972_v9, %v4713_v42  ;;  %v3361_v55 = vsel %vm105_vm0, %v3339_v57, 0.0 }
 0x31f   :  { %v3360_v15 = vadd.f32 %v3359_v14, %v3358_v25  ;;  %v3341_v43 = vmul.f32 %v3325_v35, %v3181_v31  ;;  %v3180_v28 = vmul.f32 %v3164_v46, %v4872_v40  ;;  %v3166_v12 = vadd.f32 0.0009, %v3150_v53  ;;  %v5236_v25 = vld [vmem:[#allocation24_spill] sm:$0xff] }
 0x320   :  { %v3183_v2 = vmul.f32 %v3167_v30, %v4882_v36  ;;  %v3153_v60 = vmul.f32 2.0, %v3105_v34  ;;  %v3104_v27 = vsub.f32 %v2993_v37, %v4722_v56  ;;  %v3315_v16 = vsub.f32 2.0, %v5052_v63  ;;  %v3975_v42 = vpop.f32.mrb[78].mxu1  ;;  %v5232_v56 = vld [vmem:[#allocation40_spill] sm:$0xff] }
 0x321   :  { %v3340_v39 = vmul.f32 %v3324_v3, %v3180_v28  ;;  %v3362_v6 = vadd.f32 %v3361_v55, %v3360_v15  ;;  %v3326_v17 = vmul.f32 %v5005_v0, %v3310_v22  ;;  %v3182_v59 = vmul.f32 %v3166_v12, %v4890_v51  ;;  %v3003_v38 = vpop.f32.mrb[79].mxu1 }
 0x322   :  { %v3343_v32 = vmul.f32 %v3327_v11, %v3183_v2  ;;  %v3169_v47 = vadd.f32 0.0009, %v3153_v60  ;;  %v3152_v35 = vmul.f32 2.0, %v3104_v27  ;;  %v3314_v40 = vsub.f32 2.0, %v5059_v62  ;;  %v5234_v62 = vld [vmem:[#allocation34_spill] sm:$0xff] }
 0x323   :  { %v3363_v36 = vsel %vm105_vm0, %v3340_v39, 0.0  ;;  %v3107_v19 = vsub.f32 %v3975_v42, %v5191_v20  ;;  %v3106_v13 = vsub.f32 %v3003_v38, %v5232_v56  ;;  %v3342_v58 = vmul.f32 %v3326_v17, %v3182_v59 }
 0x324   :  { %v3364_v63 = vadd.f32 %v3363_v36, %v3362_v6  ;;  %v3185_v48 = vmul.f32 %v3169_v47, %v5233_v49  ;;  %v3329_v0 = vmul.f32 %v5010_v7, %v3313_v10  ;;  %v3365_v51 = vsel %vm105_vm0, %v3341_v43, 0.0 }
 0x325   :  { %v3168_v22 = vadd.f32 0.0009, %v3152_v35  ;;  %v3155_v52 = vmul.f32 2.0, %v3107_v19  ;;  %v3154_v29 = vmul.f32 2.0, %v3106_v13  ;;  %v3138_v1 = vadd.f32 0.0001, %v5234_v62 }
 0x326   :  { %v3366_v26 = vadd.f32 %v3365_v51, %v3364_v63  ;;  %v3367_v20 = vsel %vm105_vm0, %v3342_v58, 0.0  ;;  %v3345_v21 = vmul.f32 %v3329_v0, %v3185_v48  ;;  %v3328_v57 = vmul.f32 %v5018_v41, %v3312_v24 }
 0x327   :  { %v3184_v33 = vmul.f32 %v3168_v22, %v5235_v54  ;;  %v3171_v8 = vadd.f32 0.0009, %v3155_v52  ;;  %v3170_v44 = vadd.f32 0.0009, %v3154_v29  ;;  %v3369_v7 = vsel %vm105_vm0, %v3343_v32, 0.0 }
 0x328   :  { %v3368_v10 = vadd.f32 %v3367_v20, %v3366_v26  ;;  %v3331_v18 = vmul.f32 %v5039_v45, %v3315_v16  ;;  %v3330_v31 = vmul.f32 %v5045_v61, %v3314_v40  ;;  %v3373_v41 = vsel %vm105_vm0, %v3345_v21, 0.0 }
 0x329   :  { %v3344_v4 = vmul.f32 %v3328_v57, %v3184_v33  ;;  %v3187_v5 = vmul.f32 %v3171_v8, %v5236_v25  ;;  %v3186_v50 = vmul.f32 %v3170_v44, %v3138_v1 }
 0x32a   :  { %v3370_v46 = vadd.f32 %v3369_v7, %v3368_v10 }
 0x32b   :  { %v3371_v3 = vsel %vm105_vm0, %v3344_v4, 0.0  ;;  %v3347_v11 = vmul.f32 %v3331_v18, %v3187_v5  ;;  %v3346_v23 = vmul.f32 %v3330_v31, %v3186_v50 }
 0x32c   :  { %v3372_v9 = vadd.f32 %v3371_v3, %v3370_v46 }
 0x32d   :  { %v3375_v24 = vsel %vm105_vm0, %v3346_v23, 0.0  ;;  %v3377_v45 = vsel %vm105_vm0, %v3347_v11, 0.0 }
 0x32e   :  { %v3374_v14 = vadd.f32 %v3373_v41, %v3372_v9 }
 0x330   :  { %v3376_v30 = vadd.f32 %v3375_v24, %v3374_v14 }
 0x332   :  { %v3378_v53 = vadd.f32 %v3377_v45, %v3376_v30 }
 0x334   :  { %v3379_v34 = vrot.slane %v3378_v53, 4 }
 0x336   :  { %v3380_v37 = vadd.f32 %v3379_v34, %v3378_v53 }
 0x338   :  { %v3381_v55 = vrot.slane %v3380_v37, 2 }
 0x33a   :  { %v3382_v15 = vadd.f32 %v3381_v55, %v3380_v37 }
 0x33c   :  { %v3383_v61 = vrot.slane %v3382_v15, 1 }
 0x33e   :  { %v3384_v43 = vadd.f32 %v3383_v61, %v3382_v15 }
 0x340   :  { %3386 = vst.msk [vmem:[#allocation11] sm:$0x1] %vm3385_vm1, %v3384_v43 }
 0x341   :  { %4123 = shalt.err (!%p4120_p8)
}
 0x342   :  { %s4124_s14 = scalar_lea.hbm %s5119_s4, 16 }
 0x343   :  { %p4125_p9 = scmp.ne.s32.totalorder %s5119_s4, %s4124_s14  ;;  %p4128_p10 = scmp.lt.u32.totalorder %s4124_s14, %s5119_s4 }
 0x345   :  { %p4130_p11 = pnand %p4128_p10, %p4125_p9 }
 0x347   :  { %4133 = shalt.err (!%p4130_p11)
}
 0x348   :  { %3396 = dma.vmem_to_hbm [thread:$0]  %s3394_s27, 16, %s5119_s4, [#allocation5]  }
 0x349   :  { %4140 = dma.done.wait [#allocation5], 16  }
 0x34a   :  { %4141 = vsyncadd [#allocation5], 4294967280 }
 0x34b   :  { %3400 = vsyncpa [#allocation4], 1 }
 0x34c   :  { %3401 = vsyncpa [#allocation7], 1 }
 0x34d   :  { %3402 = vsyncpa [#allocation10], 1 }
 0x34e   :  { %3403 = vsyncpa [#allocation5], 1 }

</bundles_post_ra>
